<compile_context>
chip_gen: v6e
topology: v6e:2x2x1
jax: 0.10.0
libtpu: 0.0.40
codegen_flags: <defaults>
</compile_context>

<pallas_src>
import jax
import jax.numpy as jnp
from jax.experimental import pallas as pl
from jax.experimental.pallas import tpu as pltpu

# ---- model hyper-parameters (small, synthetic config) -----------------------
HIDDEN = 32          # config.hidden_size
NUM_HEADS = 2
HEAD_DIM = HIDDEN // NUM_HEADS
NUM_LAYERS = 2
INNER = 64           # FFN inner size
MAX_SEQ_LEN = 8      # args.max_seq_len
NUM_ITEMS = 50       # num_items (padding_idx == NUM_ITEMS)
N_OUT = NUM_ITEMS + 1
N_PAD = 128          # lane-dense padded logits width (sliced back in wrapper)
EPS = 1e-12          # LayerNorm eps (matches nn.LayerNorm(eps=1e-12))

# ---- packed weight-slab layout (rows of a (SLAB_ROWS, 128) f32 array) -------
VPAD = 64                       # item table rows padded 51 -> 64
SLAB_W = 128
R_GLOB = 0                      # row 0: ln_g, row 1: ln_b, row 2: b_out(128)
R_POS = 8                       # rows  8..15  : pos_emb (L=8, 32)
R_ITEM = 16                     # rows 16..79  : item_emb padded (64, 32)
R_WOUT = 80                     # rows 80..111 : w_out padded (32, 128)
R_LAYER0 = 112
O_WQKV, O_WO, O_W1, O_W2, O_BIAS = 0, 32, 64, 96, 160
LAYER_STRIDE = 168              # 32+32+32+64 weight rows + 8 bias/LN rows
SLAB_ROWS = R_LAYER0 + NUM_LAYERS * LAYER_STRIDE    # 448 (multiple of 8)


def _layer_norm(x, g, b):
    mu = jnp.mean(x, axis=-1, keepdims=True)
    var = jnp.mean(jnp.square(x - mu), axis=-1, keepdims=True)
    return (x - mu) * jax.lax.rsqrt(var + EPS) * g + b


# ---- fused kernel: embed + pos-add + LN + encoder layers + output proj -------
def _duorec_kernel(seqs_ref, slab_ref, out_ref):
    BB, L = seqs_ref.shape
    R = BB * L

    ids = seqs_ref[...]                                       # (BB, L) int32
    pad = ids == NUM_ITEMS                                    # (BB, L) bool

    # global params
    glob = slab_ref[pl.ds(R_GLOB, 8), :]                      # (8, 128)
    ln_g, ln_b = glob[0, :HIDDEN], glob[1, :HIDDEN]
    b_out = glob[2, :]                                        # (128,)
    pos = slab_ref[pl.ds(R_POS, L), :HIDDEN]                  # (L, H)
    table = slab_ref[pl.ds(R_ITEM, VPAD), :HIDDEN]            # (VPAD, H)

    # in-kernel embedding gather via one-hot matmul (MXU is idle at this size)
    onehot = (jax.lax.broadcasted_iota(jnp.int32, (BB, L, VPAD), 2)
              == ids[:, :, None]).astype(jnp.float32)
    emb = jnp.dot(onehot.reshape(R, VPAD), table,
                  preferred_element_type=jnp.float32)         # (R, H)

    # positional add + input LayerNorm (dropout is identity in eval mode)
    x = emb * (HIDDEN ** 0.5) + jnp.tile(pos, (BB, 1))        # row r uses pos[r % L]
    x = _layer_norm(x, ln_g, ln_b)

    # bool attention mask: causal + key padding (applied lazily via where)
    row = jax.lax.broadcasted_iota(jnp.int32, (L, L), 0)
    col = jax.lax.broadcasted_iota(jnp.int32, (L, L), 1)
    allow = (row >= col)[None, :, :] & jnp.logical_not(pad)[:, None, :]   # (BB,L,L)

    scale = 1.0 / (HEAD_DIM ** 0.5)
    for l in range(NUM_LAYERS):
        base = R_LAYER0 + l * LAYER_STRIDE
        wqkv = slab_ref[pl.ds(base + O_WQKV, HIDDEN), :3 * HIDDEN]   # (32, 96)
        wo = slab_ref[pl.ds(base + O_WO, HIDDEN), :HIDDEN]           # (32, 32)
        w1 = slab_ref[pl.ds(base + O_W1, HIDDEN), :INNER]            # (32, 64)
        w2 = slab_ref[pl.ds(base + O_W2, INNER), :HIDDEN]            # (64, 32)
        bias = slab_ref[pl.ds(base + O_BIAS, 8), :]                  # (8, 128)
        bqkv, bo = bias[0, :3 * HIDDEN], bias[1, :HIDDEN]
        b1, b2 = bias[2, :INNER], bias[3, :HIDDEN]
        ln1_g, ln1_b = bias[4, :HIDDEN], bias[5, :HIDDEN]
        ln2_g, ln2_b = bias[6, :HIDDEN], bias[7, :HIDDEN]

        # ---- multi-head self-attention (fused QKV projection) ----
        qkv = jnp.dot(x, wqkv, preferred_element_type=jnp.float32) + bqkv   # (R, 96)

        ctxs = []
        for h in range(NUM_HEADS):                       # static loop, 2 heads
            sl_q = slice(h * HEAD_DIM, (h + 1) * HEAD_DIM)
            sl_k = slice(HIDDEN + h * HEAD_DIM, HIDDEN + (h + 1) * HEAD_DIM)
            sl_v = slice(2 * HIDDEN + h * HEAD_DIM, 2 * HIDDEN + (h + 1) * HEAD_DIM)
            qh = qkv[:, sl_q].reshape(BB, L, HEAD_DIM)
            kh = qkv[:, sl_k].reshape(BB, L, HEAD_DIM)
            vh = qkv[:, sl_v].reshape(BB, L, HEAD_DIM)
            s = jnp.einsum('bqd,bkd->bqk', qh, kh,
                           preferred_element_type=jnp.float32)       # (BB,L,L)
            s = jnp.where(allow, s * scale, -1e9)        # lazy masked scores
            s = s - jnp.max(s, axis=-1, keepdims=True)
            p = jnp.exp(s)
            p = p * pl.reciprocal(jnp.sum(p, axis=-1, keepdims=True), approx=True)
            ctxs.append(jnp.einsum('bqk,bkd->bqd', p, vh,
                                   preferred_element_type=jnp.float32))
        ctx = jnp.concatenate(ctxs, axis=-1).reshape(R, HIDDEN)      # (R, 32)
        attn = jnp.dot(ctx, wo, preferred_element_type=jnp.float32) + bo
        x = _layer_norm(x + attn, ln1_g, ln1_b)

        # ---- feed-forward ----
        h1 = jnp.dot(x, w1, preferred_element_type=jnp.float32) + b1
        h1 = jax.nn.gelu(h1, approximate=True)   # tanh-GELU (~1e-3 vs erf)
        h2 = jnp.dot(h1, w2, preferred_element_type=jnp.float32) + b2
        x = _layer_norm(x + h2, ln2_g, ln2_b)

    # ---- fused output projection [linear | linear_pad], lane-padded to 128 ----
    w_out = slab_ref[pl.ds(R_WOUT, HIDDEN), :]                       # (32, 128)
    logits = jnp.dot(x, w_out, preferred_element_type=jnp.float32) + b_out
    out_ref[...] = logits.astype(out_ref.dtype)


# ---- wrapper -----------------------------------------------------------------
def _pick_batch_block(B):
    for bb in (32, 16, 8):                  # sublane-aligned batch blocks
        if B % bb == 0:
            return bb
    return B                                # small batches: whole batch / block


@jax.jit
def duorec_forward(seqs, slab):
    B, L = seqs.shape
    BB = _pick_batch_block(B)
    nb = B // BB

    logits_p = pl.pallas_call(
        _duorec_kernel,
        out_shape=jax.ShapeDtypeStruct((B * L, N_PAD), jnp.float32),
        grid=(nb,),
        in_specs=[
            pl.BlockSpec((BB, L), lambda i: (i, 0)),                 # seqs block
            pl.BlockSpec((SLAB_ROWS, SLAB_W), lambda i: (0, 0)),     # weights (resident)
        ],
        out_specs=pl.BlockSpec((BB * L, N_PAD), lambda i: (i, 0)),
        compiler_params=pltpu.CompilerParams(
            dimension_semantics=("parallel",)),
    )(seqs, slab)

    return logits_p[:, :N_OUT].reshape(B, L, N_OUT)


# ---- deterministic parameter init + one-time slab packing ---------------------
def init_params(key):
    ks = iter(jax.random.split(key, 32))

    def nrm(shape):
        return jax.random.normal(next(ks), shape, jnp.float32) * 0.02

    item_emb = nrm((NUM_ITEMS + 1, HIDDEN)).at[NUM_ITEMS].set(0.0)  # padding row = 0
    return {
        "item_emb": item_emb,
        "pos_emb": nrm((MAX_SEQ_LEN, HIDDEN)),
        "ln_g": jnp.ones((HIDDEN,), jnp.float32),
        "ln_b": jnp.zeros((HIDDEN,), jnp.float32),
        "wq": nrm((NUM_LAYERS, HIDDEN, HIDDEN)),
        "bq": jnp.zeros((NUM_LAYERS, HIDDEN), jnp.float32),
        "wk": nrm((NUM_LAYERS, HIDDEN, HIDDEN)),
        "bk": jnp.zeros((NUM_LAYERS, HIDDEN), jnp.float32),
        "wv": nrm((NUM_LAYERS, HIDDEN, HIDDEN)),
        "bv": jnp.zeros((NUM_LAYERS, HIDDEN), jnp.float32),
        "wo": nrm((NUM_LAYERS, HIDDEN, HIDDEN)),
        "bo": jnp.zeros((NUM_LAYERS, HIDDEN), jnp.float32),
        "ln1_g": jnp.ones((NUM_LAYERS, HIDDEN), jnp.float32),
        "ln1_b": jnp.zeros((NUM_LAYERS, HIDDEN), jnp.float32),
        "w1": nrm((NUM_LAYERS, HIDDEN, INNER)),
        "b1": jnp.zeros((NUM_LAYERS, INNER), jnp.float32),
        "w2": nrm((NUM_LAYERS, INNER, HIDDEN)),
        "b2": jnp.zeros((NUM_LAYERS, HIDDEN), jnp.float32),
        "ln2_g": jnp.ones((NUM_LAYERS, HIDDEN), jnp.float32),
        "ln2_b": jnp.zeros((NUM_LAYERS, HIDDEN), jnp.float32),
        # fused [linear | linear_pad]: (H, NUM_ITEMS) ++ (H, 1)
        "w_out": nrm((HIDDEN, N_OUT)),
        "b_out": jnp.zeros((N_OUT,), jnp.float32),
    }


def pack_params(p):
    """Pack all weights into one lane-dense (SLAB_ROWS, 128) f32 slab (one DMA)."""
    slab = jnp.zeros((SLAB_ROWS, SLAB_W), jnp.float32)

    def put(s, r, arr):
        arr = jnp.asarray(arr, jnp.float32)
        if arr.ndim == 1:
            arr = arr[None, :]
        return s.at[r:r + arr.shape[0], :arr.shape[1]].set(arr)

    slab = put(slab, R_GLOB + 0, p["ln_g"])
    slab = put(slab, R_GLOB + 1, p["ln_b"])
    slab = put(slab, R_GLOB + 2, jnp.pad(p["b_out"], (0, N_PAD - N_OUT)))
    slab = put(slab, R_POS, p["pos_emb"])
    slab = put(slab, R_ITEM, jnp.pad(p["item_emb"],
                                     ((0, VPAD - (NUM_ITEMS + 1)), (0, 0))))
    slab = put(slab, R_WOUT, jnp.pad(p["w_out"], ((0, 0), (0, N_PAD - N_OUT))))
    for l in range(NUM_LAYERS):
        base = R_LAYER0 + l * LAYER_STRIDE
        wqkv = jnp.concatenate([p["wq"][l], p["wk"][l], p["wv"][l]], axis=1)
        bqkv = jnp.concatenate([p["bq"][l], p["bk"][l], p["bv"][l]], axis=0)
        slab = put(slab, base + O_WQKV, wqkv)
        slab = put(slab, base + O_WO, p["wo"][l])
        slab = put(slab, base + O_W1, p["w1"][l])
        slab = put(slab, base + O_W2, p["w2"][l])
        slab = put(slab, base + O_BIAS + 0, bqkv)
        slab = put(slab, base + O_BIAS + 1, p["bo"][l])
        slab = put(slab, base + O_BIAS + 2, p["b1"][l])
        slab = put(slab, base + O_BIAS + 3, p["b2"][l])
        slab = put(slab, base + O_BIAS + 4, p["ln1_g"][l])
        slab = put(slab, base + O_BIAS + 5, p["ln1_b"][l])
        slab = put(slab, base + O_BIAS + 6, p["ln2_g"][l])
        slab = put(slab, base + O_BIAS + 7, p["ln2_b"][l])
    return slab


if __name__ == "__main__":
    key = jax.random.PRNGKey(0)
    pkey, skey = jax.random.split(key)
    params = init_params(pkey)
    slab = pack_params(params)          # one-time packing, outside the jitted path

    B = 2
    seqs = jax.random.randint(skey, (B, MAX_SEQ_LEN), 0, NUM_ITEMS + 1)  # includes pad id

    out = duorec_forward(seqs, slab)
    jax.block_until_ready(out)
    assert out.shape == (B, MAX_SEQ_LEN, N_OUT)
    print("KERNEL_OK")
</pallas_src>

<mosaic_0001>
module attributes {stable_mosaic.version = 11 : i64} {
  func.func @_duorec_kernel(%arg0: i32, %arg1: memref<2x8xi32, #tpu.memory_space<vmem>>, %arg2: memref<448x128xf32, #tpu.memory_space<vmem>>, %arg3: memref<16x128xf32, #tpu.memory_space<vmem>>) attributes {dimension_semantics = [#tpu.dimension_semantics<parallel>], iteration_bounds = array<i64: 1>, scalar_prefetch = 0 : i64, scratch_operands = 0 : i64, tpu.core_type = #tpu.core_type<tc>, window_params = [{transform_indices = @transform_0, window_bounds = array<i64: 2, 8>}, {pipeline_mode = #tpu.pipeline_mode<synchronous>, transform_indices = @transform_1, window_bounds = array<i64: 448, 128>}, {transform_indices = @transform_2, window_bounds = array<i64: 16, 128>}]} {
    %c0 = arith.constant 0 : index
    %c0_0 = arith.constant 0 : index
    %0 = vector.load %arg1[%c0, %c0_0] : memref<2x8xi32, #tpu.memory_space<vmem>>, vector<2x8xi32>
    %c50_i32 = arith.constant 50 : i32
    %1 = vector.broadcast %c50_i32 : i32 to vector<2x8xi32>
    %2 = arith.cmpi eq, %0, %1 : vector<2x8xi32>
    %c0_1 = arith.constant 0 : index
    %c0_2 = arith.constant 0 : index
    %3 = vector.load %arg2[%c0_1, %c0_2] : memref<448x128xf32, #tpu.memory_space<vmem>>, vector<8x128xf32>
    %4 = vector.extract_strided_slice %3 {offsets = [0, 0], sizes = [1, 32], strides = [1, 1]} : vector<8x128xf32> to vector<1x32xf32>
    %5 = vector.shape_cast %4 : vector<1x32xf32> to vector<32xf32>
    %6 = vector.extract_strided_slice %3 {offsets = [1, 0], sizes = [1, 32], strides = [1, 1]} : vector<8x128xf32> to vector<1x32xf32>
    %7 = vector.shape_cast %6 : vector<1x32xf32> to vector<32xf32>
    %8 = vector.extract_strided_slice %3 {offsets = [2, 0], sizes = [1, 128], strides = [1, 1]} : vector<8x128xf32> to vector<1x128xf32>
    %9 = vector.shape_cast %8 : vector<1x128xf32> to vector<128xf32>
    %c8 = arith.constant 8 : index
    %c0_3 = arith.constant 0 : index
    %10 = vector.load %arg2[%c8, %c0_3] : memref<448x128xf32, #tpu.memory_space<vmem>>, vector<8x32xf32>
    %c16 = arith.constant 16 : index
    %c0_4 = arith.constant 0 : index
    %11 = vector.load %arg2[%c16, %c0_4] : memref<448x128xf32, #tpu.memory_space<vmem>>, vector<64x32xf32>
    %12 = tpu.iota {dimensions = array<i32: 2>} : vector<2x8x64xi32>
    %13 = vector.shape_cast %0 : vector<2x8xi32> to vector<2x8x1xi32>
    %14 = vector.broadcast %13 : vector<2x8x1xi32> to vector<2x8x64xi32>
    %15 = arith.cmpi eq, %12, %14 : vector<2x8x64xi32>
    %16 = arith.extui %15 : vector<2x8x64xi1> to vector<2x8x64xi32>
    %17 = arith.sitofp %16 : vector<2x8x64xi32> to vector<2x8x64xf32>
    %18 = vector.shape_cast %17 : vector<2x8x64xf32> to vector<16x64xf32>
    %cst = arith.constant dense<0.000000e+00> : vector<16x32xf32>
    %19 = tpu.matmul %18, %11, %cst {dimension_numbers = #tpu.dot_dimension_numbers<[1], [0], [0], [1], [0, 0, 1, 1], [], []>} : vector<16x64xf32>, vector<64x32xf32>, vector<16x32xf32> -> vector<16x32xf32>
    %cst_5 = arith.constant 5.65685415 : f32
    %20 = vector.broadcast %cst_5 : f32 to vector<16x32xf32>
    %21 = arith.mulf %19, %20 : vector<16x32xf32>
    %22 = tpu.concatenate %10, %10 in 0 : vector<8x32xf32>, vector<8x32xf32> -> vector<16x32xf32>
    %23 = arith.addf %21, %22 : vector<16x32xf32>
    %cst_6 = arith.constant dense<0.000000e+00> : vector<16xf32>
    %24 = vector.multi_reduction <add>, %23, %cst_6 [1] : vector<16x32xf32> to vector<16xf32>
    %25 = vector.shape_cast %24 : vector<16xf32> to vector<16x1xf32>
    %cst_7 = arith.constant 3.200000e+01 : f32
    %26 = vector.broadcast %cst_7 : f32 to vector<16x1xf32>
    %27 = arith.divf %25, %26 : vector<16x1xf32>
    %28 = vector.broadcast %27 : vector<16x1xf32> to vector<16x32xf32>
    %29 = arith.subf %23, %28 : vector<16x32xf32>
    %30 = arith.mulf %29, %29 : vector<16x32xf32>
    %cst_8 = arith.constant dense<0.000000e+00> : vector<16xf32>
    %31 = vector.multi_reduction <add>, %30, %cst_8 [1] : vector<16x32xf32> to vector<16xf32>
    %32 = vector.shape_cast %31 : vector<16xf32> to vector<16x1xf32>
    %cst_9 = arith.constant 3.200000e+01 : f32
    %33 = vector.broadcast %cst_9 : f32 to vector<16x1xf32>
    %34 = arith.divf %32, %33 : vector<16x1xf32>
    %35 = vector.broadcast %27 : vector<16x1xf32> to vector<16x32xf32>
    %36 = arith.subf %23, %35 : vector<16x32xf32>
    %cst_10 = arith.constant 9.99999996E-13 : f32
    %37 = vector.broadcast %cst_10 : f32 to vector<16x1xf32>
    %38 = arith.addf %34, %37 : vector<16x1xf32>
    %39 = math.rsqrt %38 : vector<16x1xf32>
    %40 = vector.broadcast %39 : vector<16x1xf32> to vector<16x32xf32>
    %41 = arith.mulf %36, %40 : vector<16x32xf32>
    %42 = vector.shape_cast %5 : vector<32xf32> to vector<1x32xf32>
    %43 = vector.broadcast %42 : vector<1x32xf32> to vector<16x32xf32>
    %44 = arith.mulf %41, %43 : vector<16x32xf32>
    %45 = vector.shape_cast %7 : vector<32xf32> to vector<1x32xf32>
    %46 = vector.broadcast %45 : vector<1x32xf32> to vector<16x32xf32>
    %47 = arith.addf %44, %46 : vector<16x32xf32>
    %48 = tpu.iota {dimensions = array<i32: 0>} : vector<8x8xi32>
    %49 = tpu.iota {dimensions = array<i32: 1>} : vector<8x8xi32>
    %50 = arith.cmpi sge, %48, %49 : vector<8x8xi32>
    %51 = vector.shape_cast %50 : vector<8x8xi1> to vector<1x8x8xi1>
    %cst_11 = arith.constant dense<true> : vector<2x8xi1>
    %52 = arith.xori %2, %cst_11 : vector<2x8xi1>
    %53 = vector.shape_cast %52 : vector<2x8xi1> to vector<2x1x8xi1>
    %54 = vector.broadcast %51 : vector<1x8x8xi1> to vector<2x8x8xi1>
    %55 = vector.broadcast %53 : vector<2x1x8xi1> to vector<2x8x8xi1>
    %56 = arith.andi %54, %55 : vector<2x8x8xi1>
    %c112 = arith.constant 112 : index
    %c0_12 = arith.constant 0 : index
    %57 = vector.load %arg2[%c112, %c0_12] : memref<448x128xf32, #tpu.memory_space<vmem>>, vector<32x96xf32>
    %c144 = arith.constant 144 : index
    %c0_13 = arith.constant 0 : index
    %58 = vector.load %arg2[%c144, %c0_13] : memref<448x128xf32, #tpu.memory_space<vmem>>, vector<32x32xf32>
    %c176 = arith.constant 176 : index
    %c0_14 = arith.constant 0 : index
    %59 = vector.load %arg2[%c176, %c0_14] : memref<448x128xf32, #tpu.memory_space<vmem>>, vector<32x64xf32>
    %c208 = arith.constant 208 : index
    %c0_15 = arith.constant 0 : index
    %60 = vector.load %arg2[%c208, %c0_15] : memref<448x128xf32, #tpu.memory_space<vmem>>, vector<64x32xf32>
    %c272 = arith.constant 272 : index
    %c0_16 = arith.constant 0 : index
    %61 = vector.load %arg2[%c272, %c0_16] : memref<448x128xf32, #tpu.memory_space<vmem>>, vector<8x128xf32>
    %62 = vector.extract_strided_slice %61 {offsets = [0, 0], sizes = [1, 96], strides = [1, 1]} : vector<8x128xf32> to vector<1x96xf32>
    %63 = vector.shape_cast %62 : vector<1x96xf32> to vector<96xf32>
    %64 = vector.extract_strided_slice %61 {offsets = [1, 0], sizes = [1, 32], strides = [1, 1]} : vector<8x128xf32> to vector<1x32xf32>
    %65 = vector.shape_cast %64 : vector<1x32xf32> to vector<32xf32>
    %66 = vector.extract_strided_slice %61 {offsets = [2, 0], sizes = [1, 64], strides = [1, 1]} : vector<8x128xf32> to vector<1x64xf32>
    %67 = vector.shape_cast %66 : vector<1x64xf32> to vector<64xf32>
    %68 = vector.extract_strided_slice %61 {offsets = [3, 0], sizes = [1, 32], strides = [1, 1]} : vector<8x128xf32> to vector<1x32xf32>
    %69 = vector.shape_cast %68 : vector<1x32xf32> to vector<32xf32>
    %70 = vector.extract_strided_slice %61 {offsets = [4, 0], sizes = [1, 32], strides = [1, 1]} : vector<8x128xf32> to vector<1x32xf32>
    %71 = vector.shape_cast %70 : vector<1x32xf32> to vector<32xf32>
    %72 = vector.extract_strided_slice %61 {offsets = [5, 0], sizes = [1, 32], strides = [1, 1]} : vector<8x128xf32> to vector<1x32xf32>
    %73 = vector.shape_cast %72 : vector<1x32xf32> to vector<32xf32>
    %74 = vector.extract_strided_slice %61 {offsets = [6, 0], sizes = [1, 32], strides = [1, 1]} : vector<8x128xf32> to vector<1x32xf32>
    %75 = vector.shape_cast %74 : vector<1x32xf32> to vector<32xf32>
    %76 = vector.extract_strided_slice %61 {offsets = [7, 0], sizes = [1, 32], strides = [1, 1]} : vector<8x128xf32> to vector<1x32xf32>
    %77 = vector.shape_cast %76 : vector<1x32xf32> to vector<32xf32>
    %cst_17 = arith.constant dense<0.000000e+00> : vector<16x96xf32>
    %78 = tpu.matmul %47, %57, %cst_17 {dimension_numbers = #tpu.dot_dimension_numbers<[1], [0], [0], [1], [0, 0, 1, 1], [], []>} : vector<16x32xf32>, vector<32x96xf32>, vector<16x96xf32> -> vector<16x96xf32>
    %79 = vector.shape_cast %63 : vector<96xf32> to vector<1x96xf32>
    %80 = vector.broadcast %79 : vector<1x96xf32> to vector<16x96xf32>
    %81 = arith.addf %78, %80 : vector<16x96xf32>
    %82 = vector.extract_strided_slice %81 {offsets = [0, 0], sizes = [16, 16], strides = [1, 1]} : vector<16x96xf32> to vector<16x16xf32>
    %83 = vector.shape_cast %82 : vector<16x16xf32> to vector<2x8x16xf32>
    %84 = vector.extract_strided_slice %81 {offsets = [0, 32], sizes = [16, 16], strides = [1, 1]} : vector<16x96xf32> to vector<16x16xf32>
    %85 = vector.shape_cast %84 : vector<16x16xf32> to vector<2x8x16xf32>
    %86 = vector.extract_strided_slice %81 {offsets = [0, 64], sizes = [16, 16], strides = [1, 1]} : vector<16x96xf32> to vector<16x16xf32>
    %87 = vector.shape_cast %86 : vector<16x16xf32> to vector<2x8x16xf32>
    "tpu.trace_start"() <{level = 10 : i32, message = "bqd,bkd->bqk"}> : () -> ()
    %cst_18 = arith.constant dense<0.000000e+00> : vector<2x8x8xf32>
    %88 = tpu.matmul %83, %85, %cst_18 {dimension_numbers = #tpu.dot_dimension_numbers<[2], [2], [1], [1], [0, 0, 0, 1, 1, 1], [0], [0]>} : vector<2x8x16xf32>, vector<2x8x16xf32>, vector<2x8x8xf32> -> vector<2x8x8xf32>
    "tpu.trace_stop"() : () -> ()
    %cst_19 = arith.constant 2.500000e-01 : f32
    %89 = vector.broadcast %cst_19 : f32 to vector<2x8x8xf32>
    %90 = arith.mulf %88, %89 : vector<2x8x8xf32>
    %cst_20 = arith.constant -1.000000e+09 : f32
    %91 = vector.broadcast %cst_20 : f32 to vector<2x8x8xf32>
    %92 = arith.select %56, %90, %91 : vector<2x8x8xi1>, vector<2x8x8xf32>
    %cst_21 = arith.constant dense<0xFF800000> : vector<2x8xf32>
    %93 = vector.multi_reduction <maximumf>, %92, %cst_21 [2] : vector<2x8x8xf32> to vector<2x8xf32>
    %94 = vector.shape_cast %93 : vector<2x8xf32> to vector<2x8x1xf32>
    %95 = vector.broadcast %94 : vector<2x8x1xf32> to vector<2x8x8xf32>
    %96 = arith.subf %92, %95 : vector<2x8x8xf32>
    %97 = math.exp %96 : vector<2x8x8xf32>
    %cst_22 = arith.constant dense<0.000000e+00> : vector<2x8xf32>
    %98 = vector.multi_reduction <add>, %97, %cst_22 [2] : vector<2x8x8xf32> to vector<2x8xf32>
    %99 = vector.shape_cast %98 : vector<2x8xf32> to vector<2x8x1xf32>
    %100 = tpu.reciprocal %99 {approx = true} : vector<2x8x1xf32> -> vector<2x8x1xf32>
    %101 = vector.broadcast %100 : vector<2x8x1xf32> to vector<2x8x8xf32>
    %102 = arith.mulf %97, %101 : vector<2x8x8xf32>
    "tpu.trace_start"() <{level = 10 : i32, message = "bqk,bkd->bqd"}> : () -> ()
    %cst_23 = arith.constant dense<0.000000e+00> : vector<2x8x16xf32>
    %103 = tpu.matmul %102, %87, %cst_23 {dimension_numbers = #tpu.dot_dimension_numbers<[2], [1], [1], [2], [0, 0, 0, 1, 1, 2], [0], [0]>} : vector<2x8x8xf32>, vector<2x8x16xf32>, vector<2x8x16xf32> -> vector<2x8x16xf32>
    "tpu.trace_stop"() : () -> ()
    %104 = vector.extract_strided_slice %81 {offsets = [0, 16], sizes = [16, 16], strides = [1, 1]} : vector<16x96xf32> to vector<16x16xf32>
    %105 = vector.shape_cast %104 : vector<16x16xf32> to vector<2x8x16xf32>
    %106 = vector.extract_strided_slice %81 {offsets = [0, 48], sizes = [16, 16], strides = [1, 1]} : vector<16x96xf32> to vector<16x16xf32>
    %107 = vector.shape_cast %106 : vector<16x16xf32> to vector<2x8x16xf32>
    %108 = vector.extract_strided_slice %81 {offsets = [0, 80], sizes = [16, 16], strides = [1, 1]} : vector<16x96xf32> to vector<16x16xf32>
    %109 = vector.shape_cast %108 : vector<16x16xf32> to vector<2x8x16xf32>
    "tpu.trace_start"() <{level = 10 : i32, message = "bqd,bkd->bqk"}> : () -> ()
    %cst_24 = arith.constant dense<0.000000e+00> : vector<2x8x8xf32>
    %110 = tpu.matmul %105, %107, %cst_24 {dimension_numbers = #tpu.dot_dimension_numbers<[2], [2], [1], [1], [0, 0, 0, 1, 1, 1], [0], [0]>} : vector<2x8x16xf32>, vector<2x8x16xf32>, vector<2x8x8xf32> -> vector<2x8x8xf32>
    "tpu.trace_stop"() : () -> ()
    %cst_25 = arith.constant 2.500000e-01 : f32
    %111 = vector.broadcast %cst_25 : f32 to vector<2x8x8xf32>
    %112 = arith.mulf %110, %111 : vector<2x8x8xf32>
    %cst_26 = arith.constant -1.000000e+09 : f32
    %113 = vector.broadcast %cst_26 : f32 to vector<2x8x8xf32>
    %114 = arith.select %56, %112, %113 : vector<2x8x8xi1>, vector<2x8x8xf32>
    %cst_27 = arith.constant dense<0xFF800000> : vector<2x8xf32>
    %115 = vector.multi_reduction <maximumf>, %114, %cst_27 [2] : vector<2x8x8xf32> to vector<2x8xf32>
    %116 = vector.shape_cast %115 : vector<2x8xf32> to vector<2x8x1xf32>
    %117 = vector.broadcast %116 : vector<2x8x1xf32> to vector<2x8x8xf32>
    %118 = arith.subf %114, %117 : vector<2x8x8xf32>
    %119 = math.exp %118 : vector<2x8x8xf32>
    %cst_28 = arith.constant dense<0.000000e+00> : vector<2x8xf32>
    %120 = vector.multi_reduction <add>, %119, %cst_28 [2] : vector<2x8x8xf32> to vector<2x8xf32>
    %121 = vector.shape_cast %120 : vector<2x8xf32> to vector<2x8x1xf32>
    %122 = tpu.reciprocal %121 {approx = true} : vector<2x8x1xf32> -> vector<2x8x1xf32>
    %123 = vector.broadcast %122 : vector<2x8x1xf32> to vector<2x8x8xf32>
    %124 = arith.mulf %119, %123 : vector<2x8x8xf32>
    "tpu.trace_start"() <{level = 10 : i32, message = "bqk,bkd->bqd"}> : () -> ()
    %cst_29 = arith.constant dense<0.000000e+00> : vector<2x8x16xf32>
    %125 = tpu.matmul %124, %109, %cst_29 {dimension_numbers = #tpu.dot_dimension_numbers<[2], [1], [1], [2], [0, 0, 0, 1, 1, 2], [0], [0]>} : vector<2x8x8xf32>, vector<2x8x16xf32>, vector<2x8x16xf32> -> vector<2x8x16xf32>
    "tpu.trace_stop"() : () -> ()
    %126 = tpu.concatenate %103, %125 in 2 : vector<2x8x16xf32>, vector<2x8x16xf32> -> vector<2x8x32xf32>
    %127 = vector.shape_cast %126 : vector<2x8x32xf32> to vector<16x32xf32>
    %cst_30 = arith.constant dense<0.000000e+00> : vector<16x32xf32>
    %128 = tpu.matmul %127, %58, %cst_30 {dimension_numbers = #tpu.dot_dimension_numbers<[1], [0], [0], [1], [0, 0, 1, 1], [], []>} : vector<16x32xf32>, vector<32x32xf32>, vector<16x32xf32> -> vector<16x32xf32>
    %129 = vector.shape_cast %65 : vector<32xf32> to vector<1x32xf32>
    %130 = vector.broadcast %129 : vector<1x32xf32> to vector<16x32xf32>
    %131 = arith.addf %128, %130 : vector<16x32xf32>
    %132 = arith.addf %47, %131 : vector<16x32xf32>
    %cst_31 = arith.constant dense<0.000000e+00> : vector<16xf32>
    %133 = vector.multi_reduction <add>, %132, %cst_31 [1] : vector<16x32xf32> to vector<16xf32>
    %134 = vector.shape_cast %133 : vector<16xf32> to vector<16x1xf32>
    %cst_32 = arith.constant 3.200000e+01 : f32
    %135 = vector.broadcast %cst_32 : f32 to vector<16x1xf32>
    %136 = arith.divf %134, %135 : vector<16x1xf32>
    %137 = vector.broadcast %136 : vector<16x1xf32> to vector<16x32xf32>
    %138 = arith.subf %132, %137 : vector<16x32xf32>
    %139 = arith.mulf %138, %138 : vector<16x32xf32>
    %cst_33 = arith.constant dense<0.000000e+00> : vector<16xf32>
    %140 = vector.multi_reduction <add>, %139, %cst_33 [1] : vector<16x32xf32> to vector<16xf32>
    %141 = vector.shape_cast %140 : vector<16xf32> to vector<16x1xf32>
    %cst_34 = arith.constant 3.200000e+01 : f32
    %142 = vector.broadcast %cst_34 : f32 to vector<16x1xf32>
    %143 = arith.divf %141, %142 : vector<16x1xf32>
    %144 = vector.broadcast %136 : vector<16x1xf32> to vector<16x32xf32>
    %145 = arith.subf %132, %144 : vector<16x32xf32>
    %cst_35 = arith.constant 9.99999996E-13 : f32
    %146 = vector.broadcast %cst_35 : f32 to vector<16x1xf32>
    %147 = arith.addf %143, %146 : vector<16x1xf32>
    %148 = math.rsqrt %147 : vector<16x1xf32>
    %149 = vector.broadcast %148 : vector<16x1xf32> to vector<16x32xf32>
    %150 = arith.mulf %145, %149 : vector<16x32xf32>
    %151 = vector.shape_cast %71 : vector<32xf32> to vector<1x32xf32>
    %152 = vector.broadcast %151 : vector<1x32xf32> to vector<16x32xf32>
    %153 = arith.mulf %150, %152 : vector<16x32xf32>
    %154 = vector.shape_cast %73 : vector<32xf32> to vector<1x32xf32>
    %155 = vector.broadcast %154 : vector<1x32xf32> to vector<16x32xf32>
    %156 = arith.addf %153, %155 : vector<16x32xf32>
    %cst_36 = arith.constant dense<0.000000e+00> : vector<16x64xf32>
    %157 = tpu.matmul %156, %59, %cst_36 {dimension_numbers = #tpu.dot_dimension_numbers<[1], [0], [0], [1], [0, 0, 1, 1], [], []>} : vector<16x32xf32>, vector<32x64xf32>, vector<16x64xf32> -> vector<16x64xf32>
    %158 = vector.shape_cast %67 : vector<64xf32> to vector<1x64xf32>
    %159 = vector.broadcast %158 : vector<1x64xf32> to vector<16x64xf32>
    %160 = arith.addf %157, %159 : vector<16x64xf32>
    %161 = arith.mulf %160, %160 : vector<16x64xf32>
    %162 = arith.mulf %160, %161 : vector<16x64xf32>
    %cst_37 = arith.constant 4.471500e-02 : f32
    %163 = vector.broadcast %cst_37 : f32 to vector<16x64xf32>
    %164 = arith.mulf %163, %162 : vector<16x64xf32>
    %165 = arith.addf %160, %164 : vector<16x64xf32>
    %cst_38 = arith.constant 0.797884583 : f32
    %166 = vector.broadcast %cst_38 : f32 to vector<16x64xf32>
    %167 = arith.mulf %166, %165 : vector<16x64xf32>
    %168 = math.tanh %167 : vector<16x64xf32>
    %cst_39 = arith.constant 1.000000e+00 : f32
    %169 = vector.broadcast %cst_39 : f32 to vector<16x64xf32>
    %170 = arith.addf %169, %168 : vector<16x64xf32>
    %cst_40 = arith.constant 5.000000e-01 : f32
    %171 = vector.broadcast %cst_40 : f32 to vector<16x64xf32>
    %172 = arith.mulf %171, %170 : vector<16x64xf32>
    %173 = arith.mulf %160, %172 : vector<16x64xf32>
    %cst_41 = arith.constant dense<0.000000e+00> : vector<16x32xf32>
    %174 = tpu.matmul %173, %60, %cst_41 {dimension_numbers = #tpu.dot_dimension_numbers<[1], [0], [0], [1], [0, 0, 1, 1], [], []>} : vector<16x64xf32>, vector<64x32xf32>, vector<16x32xf32> -> vector<16x32xf32>
    %175 = vector.shape_cast %69 : vector<32xf32> to vector<1x32xf32>
    %176 = vector.broadcast %175 : vector<1x32xf32> to vector<16x32xf32>
    %177 = arith.addf %174, %176 : vector<16x32xf32>
    %178 = arith.addf %156, %177 : vector<16x32xf32>
    %cst_42 = arith.constant dense<0.000000e+00> : vector<16xf32>
    %179 = vector.multi_reduction <add>, %178, %cst_42 [1] : vector<16x32xf32> to vector<16xf32>
    %180 = vector.shape_cast %179 : vector<16xf32> to vector<16x1xf32>
    %cst_43 = arith.constant 3.200000e+01 : f32
    %181 = vector.broadcast %cst_43 : f32 to vector<16x1xf32>
    %182 = arith.divf %180, %181 : vector<16x1xf32>
    %183 = vector.broadcast %182 : vector<16x1xf32> to vector<16x32xf32>
    %184 = arith.subf %178, %183 : vector<16x32xf32>
    %185 = arith.mulf %184, %184 : vector<16x32xf32>
    %cst_44 = arith.constant dense<0.000000e+00> : vector<16xf32>
    %186 = vector.multi_reduction <add>, %185, %cst_44 [1] : vector<16x32xf32> to vector<16xf32>
    %187 = vector.shape_cast %186 : vector<16xf32> to vector<16x1xf32>
    %cst_45 = arith.constant 3.200000e+01 : f32
    %188 = vector.broadcast %cst_45 : f32 to vector<16x1xf32>
    %189 = arith.divf %187, %188 : vector<16x1xf32>
    %190 = vector.broadcast %182 : vector<16x1xf32> to vector<16x32xf32>
    %191 = arith.subf %178, %190 : vector<16x32xf32>
    %cst_46 = arith.constant 9.99999996E-13 : f32
    %192 = vector.broadcast %cst_46 : f32 to vector<16x1xf32>
    %193 = arith.addf %189, %192 : vector<16x1xf32>
    %194 = math.rsqrt %193 : vector<16x1xf32>
    %195 = vector.broadcast %194 : vector<16x1xf32> to vector<16x32xf32>
    %196 = arith.mulf %191, %195 : vector<16x32xf32>
    %197 = vector.shape_cast %75 : vector<32xf32> to vector<1x32xf32>
    %198 = vector.broadcast %197 : vector<1x32xf32> to vector<16x32xf32>
    %199 = arith.mulf %196, %198 : vector<16x32xf32>
    %200 = vector.shape_cast %77 : vector<32xf32> to vector<1x32xf32>
    %201 = vector.broadcast %200 : vector<1x32xf32> to vector<16x32xf32>
    %202 = arith.addf %199, %201 : vector<16x32xf32>
    %c280 = arith.constant 280 : index
    %c0_47 = arith.constant 0 : index
    %203 = vector.load %arg2[%c280, %c0_47] : memref<448x128xf32, #tpu.memory_space<vmem>>, vector<32x96xf32>
    %c312 = arith.constant 312 : index
    %c0_48 = arith.constant 0 : index
    %204 = vector.load %arg2[%c312, %c0_48] : memref<448x128xf32, #tpu.memory_space<vmem>>, vector<32x32xf32>
    %c344 = arith.constant 344 : index
    %c0_49 = arith.constant 0 : index
    %205 = vector.load %arg2[%c344, %c0_49] : memref<448x128xf32, #tpu.memory_space<vmem>>, vector<32x64xf32>
    %c376 = arith.constant 376 : index
    %c0_50 = arith.constant 0 : index
    %206 = vector.load %arg2[%c376, %c0_50] : memref<448x128xf32, #tpu.memory_space<vmem>>, vector<64x32xf32>
    %c440 = arith.constant 440 : index
    %c0_51 = arith.constant 0 : index
    %207 = vector.load %arg2[%c440, %c0_51] : memref<448x128xf32, #tpu.memory_space<vmem>>, vector<8x128xf32>
    %208 = vector.extract_strided_slice %207 {offsets = [0, 0], sizes = [1, 96], strides = [1, 1]} : vector<8x128xf32> to vector<1x96xf32>
    %209 = vector.shape_cast %208 : vector<1x96xf32> to vector<96xf32>
    %210 = vector.extract_strided_slice %207 {offsets = [1, 0], sizes = [1, 32], strides = [1, 1]} : vector<8x128xf32> to vector<1x32xf32>
    %211 = vector.shape_cast %210 : vector<1x32xf32> to vector<32xf32>
    %212 = vector.extract_strided_slice %207 {offsets = [2, 0], sizes = [1, 64], strides = [1, 1]} : vector<8x128xf32> to vector<1x64xf32>
    %213 = vector.shape_cast %212 : vector<1x64xf32> to vector<64xf32>
    %214 = vector.extract_strided_slice %207 {offsets = [3, 0], sizes = [1, 32], strides = [1, 1]} : vector<8x128xf32> to vector<1x32xf32>
    %215 = vector.shape_cast %214 : vector<1x32xf32> to vector<32xf32>
    %216 = vector.extract_strided_slice %207 {offsets = [4, 0], sizes = [1, 32], strides = [1, 1]} : vector<8x128xf32> to vector<1x32xf32>
    %217 = vector.shape_cast %216 : vector<1x32xf32> to vector<32xf32>
    %218 = vector.extract_strided_slice %207 {offsets = [5, 0], sizes = [1, 32], strides = [1, 1]} : vector<8x128xf32> to vector<1x32xf32>
    %219 = vector.shape_cast %218 : vector<1x32xf32> to vector<32xf32>
    %220 = vector.extract_strided_slice %207 {offsets = [6, 0], sizes = [1, 32], strides = [1, 1]} : vector<8x128xf32> to vector<1x32xf32>
    %221 = vector.shape_cast %220 : vector<1x32xf32> to vector<32xf32>
    %222 = vector.extract_strided_slice %207 {offsets = [7, 0], sizes = [1, 32], strides = [1, 1]} : vector<8x128xf32> to vector<1x32xf32>
    %223 = vector.shape_cast %222 : vector<1x32xf32> to vector<32xf32>
    %cst_52 = arith.constant dense<0.000000e+00> : vector<16x96xf32>
    %224 = tpu.matmul %202, %203, %cst_52 {dimension_numbers = #tpu.dot_dimension_numbers<[1], [0], [0], [1], [0, 0, 1, 1], [], []>} : vector<16x32xf32>, vector<32x96xf32>, vector<16x96xf32> -> vector<16x96xf32>
    %225 = vector.shape_cast %209 : vector<96xf32> to vector<1x96xf32>
    %226 = vector.broadcast %225 : vector<1x96xf32> to vector<16x96xf32>
    %227 = arith.addf %224, %226 : vector<16x96xf32>
    %228 = vector.extract_strided_slice %227 {offsets = [0, 0], sizes = [16, 16], strides = [1, 1]} : vector<16x96xf32> to vector<16x16xf32>
    %229 = vector.shape_cast %228 : vector<16x16xf32> to vector<2x8x16xf32>
    %230 = vector.extract_strided_slice %227 {offsets = [0, 32], sizes = [16, 16], strides = [1, 1]} : vector<16x96xf32> to vector<16x16xf32>
    %231 = vector.shape_cast %230 : vector<16x16xf32> to vector<2x8x16xf32>
    %232 = vector.extract_strided_slice %227 {offsets = [0, 64], sizes = [16, 16], strides = [1, 1]} : vector<16x96xf32> to vector<16x16xf32>
    %233 = vector.shape_cast %232 : vector<16x16xf32> to vector<2x8x16xf32>
    "tpu.trace_start"() <{level = 10 : i32, message = "bqd,bkd->bqk"}> : () -> ()
    %cst_53 = arith.constant dense<0.000000e+00> : vector<2x8x8xf32>
    %234 = tpu.matmul %229, %231, %cst_53 {dimension_numbers = #tpu.dot_dimension_numbers<[2], [2], [1], [1], [0, 0, 0, 1, 1, 1], [0], [0]>} : vector<2x8x16xf32>, vector<2x8x16xf32>, vector<2x8x8xf32> -> vector<2x8x8xf32>
    "tpu.trace_stop"() : () -> ()
    %cst_54 = arith.constant 2.500000e-01 : f32
    %235 = vector.broadcast %cst_54 : f32 to vector<2x8x8xf32>
    %236 = arith.mulf %234, %235 : vector<2x8x8xf32>
    %cst_55 = arith.constant -1.000000e+09 : f32
    %237 = vector.broadcast %cst_55 : f32 to vector<2x8x8xf32>
    %238 = arith.select %56, %236, %237 : vector<2x8x8xi1>, vector<2x8x8xf32>
    %cst_56 = arith.constant dense<0xFF800000> : vector<2x8xf32>
    %239 = vector.multi_reduction <maximumf>, %238, %cst_56 [2] : vector<2x8x8xf32> to vector<2x8xf32>
    %240 = vector.shape_cast %239 : vector<2x8xf32> to vector<2x8x1xf32>
    %241 = vector.broadcast %240 : vector<2x8x1xf32> to vector<2x8x8xf32>
    %242 = arith.subf %238, %241 : vector<2x8x8xf32>
    %243 = math.exp %242 : vector<2x8x8xf32>
    %cst_57 = arith.constant dense<0.000000e+00> : vector<2x8xf32>
    %244 = vector.multi_reduction <add>, %243, %cst_57 [2] : vector<2x8x8xf32> to vector<2x8xf32>
    %245 = vector.shape_cast %244 : vector<2x8xf32> to vector<2x8x1xf32>
    %246 = tpu.reciprocal %245 {approx = true} : vector<2x8x1xf32> -> vector<2x8x1xf32>
    %247 = vector.broadcast %246 : vector<2x8x1xf32> to vector<2x8x8xf32>
    %248 = arith.mulf %243, %247 : vector<2x8x8xf32>
    "tpu.trace_start"() <{level = 10 : i32, message = "bqk,bkd->bqd"}> : () -> ()
    %cst_58 = arith.constant dense<0.000000e+00> : vector<2x8x16xf32>
    %249 = tpu.matmul %248, %233, %cst_58 {dimension_numbers = #tpu.dot_dimension_numbers<[2], [1], [1], [2], [0, 0, 0, 1, 1, 2], [0], [0]>} : vector<2x8x8xf32>, vector<2x8x16xf32>, vector<2x8x16xf32> -> vector<2x8x16xf32>
    "tpu.trace_stop"() : () -> ()
    %250 = vector.extract_strided_slice %227 {offsets = [0, 16], sizes = [16, 16], strides = [1, 1]} : vector<16x96xf32> to vector<16x16xf32>
    %251 = vector.shape_cast %250 : vector<16x16xf32> to vector<2x8x16xf32>
    %252 = vector.extract_strided_slice %227 {offsets = [0, 48], sizes = [16, 16], strides = [1, 1]} : vector<16x96xf32> to vector<16x16xf32>
    %253 = vector.shape_cast %252 : vector<16x16xf32> to vector<2x8x16xf32>
    %254 = vector.extract_strided_slice %227 {offsets = [0, 80], sizes = [16, 16], strides = [1, 1]} : vector<16x96xf32> to vector<16x16xf32>
    %255 = vector.shape_cast %254 : vector<16x16xf32> to vector<2x8x16xf32>
    "tpu.trace_start"() <{level = 10 : i32, message = "bqd,bkd->bqk"}> : () -> ()
    %cst_59 = arith.constant dense<0.000000e+00> : vector<2x8x8xf32>
    %256 = tpu.matmul %251, %253, %cst_59 {dimension_numbers = #tpu.dot_dimension_numbers<[2], [2], [1], [1], [0, 0, 0, 1, 1, 1], [0], [0]>} : vector<2x8x16xf32>, vector<2x8x16xf32>, vector<2x8x8xf32> -> vector<2x8x8xf32>
    "tpu.trace_stop"() : () -> ()
    %cst_60 = arith.constant 2.500000e-01 : f32
    %257 = vector.broadcast %cst_60 : f32 to vector<2x8x8xf32>
    %258 = arith.mulf %256, %257 : vector<2x8x8xf32>
    %cst_61 = arith.constant -1.000000e+09 : f32
    %259 = vector.broadcast %cst_61 : f32 to vector<2x8x8xf32>
    %260 = arith.select %56, %258, %259 : vector<2x8x8xi1>, vector<2x8x8xf32>
    %cst_62 = arith.constant dense<0xFF800000> : vector<2x8xf32>
    %261 = vector.multi_reduction <maximumf>, %260, %cst_62 [2] : vector<2x8x8xf32> to vector<2x8xf32>
    %262 = vector.shape_cast %261 : vector<2x8xf32> to vector<2x8x1xf32>
    %263 = vector.broadcast %262 : vector<2x8x1xf32> to vector<2x8x8xf32>
    %264 = arith.subf %260, %263 : vector<2x8x8xf32>
    %265 = math.exp %264 : vector<2x8x8xf32>
    %cst_63 = arith.constant dense<0.000000e+00> : vector<2x8xf32>
    %266 = vector.multi_reduction <add>, %265, %cst_63 [2] : vector<2x8x8xf32> to vector<2x8xf32>
    %267 = vector.shape_cast %266 : vector<2x8xf32> to vector<2x8x1xf32>
    %268 = tpu.reciprocal %267 {approx = true} : vector<2x8x1xf32> -> vector<2x8x1xf32>
    %269 = vector.broadcast %268 : vector<2x8x1xf32> to vector<2x8x8xf32>
    %270 = arith.mulf %265, %269 : vector<2x8x8xf32>
    "tpu.trace_start"() <{level = 10 : i32, message = "bqk,bkd->bqd"}> : () -> ()
    %cst_64 = arith.constant dense<0.000000e+00> : vector<2x8x16xf32>
    %271 = tpu.matmul %270, %255, %cst_64 {dimension_numbers = #tpu.dot_dimension_numbers<[2], [1], [1], [2], [0, 0, 0, 1, 1, 2], [0], [0]>} : vector<2x8x8xf32>, vector<2x8x16xf32>, vector<2x8x16xf32> -> vector<2x8x16xf32>
    "tpu.trace_stop"() : () -> ()
    %272 = tpu.concatenate %249, %271 in 2 : vector<2x8x16xf32>, vector<2x8x16xf32> -> vector<2x8x32xf32>
    %273 = vector.shape_cast %272 : vector<2x8x32xf32> to vector<16x32xf32>
    %cst_65 = arith.constant dense<0.000000e+00> : vector<16x32xf32>
    %274 = tpu.matmul %273, %204, %cst_65 {dimension_numbers = #tpu.dot_dimension_numbers<[1], [0], [0], [1], [0, 0, 1, 1], [], []>} : vector<16x32xf32>, vector<32x32xf32>, vector<16x32xf32> -> vector<16x32xf32>
    %275 = vector.shape_cast %211 : vector<32xf32> to vector<1x32xf32>
    %276 = vector.broadcast %275 : vector<1x32xf32> to vector<16x32xf32>
    %277 = arith.addf %274, %276 : vector<16x32xf32>
    %278 = arith.addf %202, %277 : vector<16x32xf32>
    %cst_66 = arith.constant dense<0.000000e+00> : vector<16xf32>
    %279 = vector.multi_reduction <add>, %278, %cst_66 [1] : vector<16x32xf32> to vector<16xf32>
    %280 = vector.shape_cast %279 : vector<16xf32> to vector<16x1xf32>
    %cst_67 = arith.constant 3.200000e+01 : f32
    %281 = vector.broadcast %cst_67 : f32 to vector<16x1xf32>
    %282 = arith.divf %280, %281 : vector<16x1xf32>
    %283 = vector.broadcast %282 : vector<16x1xf32> to vector<16x32xf32>
    %284 = arith.subf %278, %283 : vector<16x32xf32>
    %285 = arith.mulf %284, %284 : vector<16x32xf32>
    %cst_68 = arith.constant dense<0.000000e+00> : vector<16xf32>
    %286 = vector.multi_reduction <add>, %285, %cst_68 [1] : vector<16x32xf32> to vector<16xf32>
    %287 = vector.shape_cast %286 : vector<16xf32> to vector<16x1xf32>
    %cst_69 = arith.constant 3.200000e+01 : f32
    %288 = vector.broadcast %cst_69 : f32 to vector<16x1xf32>
    %289 = arith.divf %287, %288 : vector<16x1xf32>
    %290 = vector.broadcast %282 : vector<16x1xf32> to vector<16x32xf32>
    %291 = arith.subf %278, %290 : vector<16x32xf32>
    %cst_70 = arith.constant 9.99999996E-13 : f32
    %292 = vector.broadcast %cst_70 : f32 to vector<16x1xf32>
    %293 = arith.addf %289, %292 : vector<16x1xf32>
    %294 = math.rsqrt %293 : vector<16x1xf32>
    %295 = vector.broadcast %294 : vector<16x1xf32> to vector<16x32xf32>
    %296 = arith.mulf %291, %295 : vector<16x32xf32>
    %297 = vector.shape_cast %217 : vector<32xf32> to vector<1x32xf32>
    %298 = vector.broadcast %297 : vector<1x32xf32> to vector<16x32xf32>
    %299 = arith.mulf %296, %298 : vector<16x32xf32>
    %300 = vector.shape_cast %219 : vector<32xf32> to vector<1x32xf32>
    %301 = vector.broadcast %300 : vector<1x32xf32> to vector<16x32xf32>
    %302 = arith.addf %299, %301 : vector<16x32xf32>
    %cst_71 = arith.constant dense<0.000000e+00> : vector<16x64xf32>
    %303 = tpu.matmul %302, %205, %cst_71 {dimension_numbers = #tpu.dot_dimension_numbers<[1], [0], [0], [1], [0, 0, 1, 1], [], []>} : vector<16x32xf32>, vector<32x64xf32>, vector<16x64xf32> -> vector<16x64xf32>
    %304 = vector.shape_cast %213 : vector<64xf32> to vector<1x64xf32>
    %305 = vector.broadcast %304 : vector<1x64xf32> to vector<16x64xf32>
    %306 = arith.addf %303, %305 : vector<16x64xf32>
    %307 = arith.mulf %306, %306 : vector<16x64xf32>
    %308 = arith.mulf %306, %307 : vector<16x64xf32>
    %cst_72 = arith.constant 4.471500e-02 : f32
    %309 = vector.broadcast %cst_72 : f32 to vector<16x64xf32>
    %310 = arith.mulf %309, %308 : vector<16x64xf32>
    %311 = arith.addf %306, %310 : vector<16x64xf32>
    %cst_73 = arith.constant 0.797884583 : f32
    %312 = vector.broadcast %cst_73 : f32 to vector<16x64xf32>
    %313 = arith.mulf %312, %311 : vector<16x64xf32>
    %314 = math.tanh %313 : vector<16x64xf32>
    %cst_74 = arith.constant 1.000000e+00 : f32
    %315 = vector.broadcast %cst_74 : f32 to vector<16x64xf32>
    %316 = arith.addf %315, %314 : vector<16x64xf32>
    %cst_75 = arith.constant 5.000000e-01 : f32
    %317 = vector.broadcast %cst_75 : f32 to vector<16x64xf32>
    %318 = arith.mulf %317, %316 : vector<16x64xf32>
    %319 = arith.mulf %306, %318 : vector<16x64xf32>
    %cst_76 = arith.constant dense<0.000000e+00> : vector<16x32xf32>
    %320 = tpu.matmul %319, %206, %cst_76 {dimension_numbers = #tpu.dot_dimension_numbers<[1], [0], [0], [1], [0, 0, 1, 1], [], []>} : vector<16x64xf32>, vector<64x32xf32>, vector<16x32xf32> -> vector<16x32xf32>
    %321 = vector.shape_cast %215 : vector<32xf32> to vector<1x32xf32>
    %322 = vector.broadcast %321 : vector<1x32xf32> to vector<16x32xf32>
    %323 = arith.addf %320, %322 : vector<16x32xf32>
    %324 = arith.addf %302, %323 : vector<16x32xf32>
    %cst_77 = arith.constant dense<0.000000e+00> : vector<16xf32>
    %325 = vector.multi_reduction <add>, %324, %cst_77 [1] : vector<16x32xf32> to vector<16xf32>
    %326 = vector.shape_cast %325 : vector<16xf32> to vector<16x1xf32>
    %cst_78 = arith.constant 3.200000e+01 : f32
    %327 = vector.broadcast %cst_78 : f32 to vector<16x1xf32>
    %328 = arith.divf %326, %327 : vector<16x1xf32>
    %329 = vector.broadcast %328 : vector<16x1xf32> to vector<16x32xf32>
    %330 = arith.subf %324, %329 : vector<16x32xf32>
    %331 = arith.mulf %330, %330 : vector<16x32xf32>
    %cst_79 = arith.constant dense<0.000000e+00> : vector<16xf32>
    %332 = vector.multi_reduction <add>, %331, %cst_79 [1] : vector<16x32xf32> to vector<16xf32>
    %333 = vector.shape_cast %332 : vector<16xf32> to vector<16x1xf32>
    %cst_80 = arith.constant 3.200000e+01 : f32
    %334 = vector.broadcast %cst_80 : f32 to vector<16x1xf32>
    %335 = arith.divf %333, %334 : vector<16x1xf32>
    %336 = vector.broadcast %328 : vector<16x1xf32> to vector<16x32xf32>
    %337 = arith.subf %324, %336 : vector<16x32xf32>
    %cst_81 = arith.constant 9.99999996E-13 : f32
    %338 = vector.broadcast %cst_81 : f32 to vector<16x1xf32>
    %339 = arith.addf %335, %338 : vector<16x1xf32>
    %340 = math.rsqrt %339 : vector<16x1xf32>
    %341 = vector.broadcast %340 : vector<16x1xf32> to vector<16x32xf32>
    %342 = arith.mulf %337, %341 : vector<16x32xf32>
    %343 = vector.shape_cast %221 : vector<32xf32> to vector<1x32xf32>
    %344 = vector.broadcast %343 : vector<1x32xf32> to vector<16x32xf32>
    %345 = arith.mulf %342, %344 : vector<16x32xf32>
    %346 = vector.shape_cast %223 : vector<32xf32> to vector<1x32xf32>
    %347 = vector.broadcast %346 : vector<1x32xf32> to vector<16x32xf32>
    %348 = arith.addf %345, %347 : vector<16x32xf32>
    %c80 = arith.constant 80 : index
    %c0_82 = arith.constant 0 : index
    %349 = vector.load %arg2[%c80, %c0_82] : memref<448x128xf32, #tpu.memory_space<vmem>>, vector<32x128xf32>
    %cst_83 = arith.constant dense<0.000000e+00> : vector<16x128xf32>
    %350 = tpu.matmul %348, %349, %cst_83 {dimension_numbers = #tpu.dot_dimension_numbers<[1], [0], [0], [1], [0, 0, 1, 1], [], []>} : vector<16x32xf32>, vector<32x128xf32>, vector<16x128xf32> -> vector<16x128xf32>
    %351 = vector.shape_cast %9 : vector<128xf32> to vector<1x128xf32>
    %352 = vector.broadcast %351 : vector<1x128xf32> to vector<16x128xf32>
    %353 = arith.addf %350, %352 : vector<16x128xf32>
    %c0_84 = arith.constant 0 : index
    %c0_85 = arith.constant 0 : index
    %354 = vector.load %arg3[%c0_84, %c0_85] : memref<16x128xf32, #tpu.memory_space<vmem>>, vector<16x128xf32>
    tpu.vector_store %arg3[%c0_84, %c0_85], %353 {strides = array<i32>} : memref<16x128xf32, #tpu.memory_space<vmem>>, vector<16x128xf32>,
    return
  }
  func.func @transform_0(%arg0: i32) -> (i32, i32) {
    %c0_i32 = arith.constant 0 : i32
    %c0_i32_0 = arith.constant 0 : i32
    return %arg0, %c0_i32 : i32, i32
  }
  func.func @transform_1(%arg0: i32) -> (i32, i32) {
    %c0_i32 = arith.constant 0 : i32
    %c0_i32_0 = arith.constant 0 : i32
    %c0_i32_1 = arith.constant 0 : i32
    return %c0_i32, %c0_i32_0 : i32, i32
  }
  func.func @transform_2(%arg0: i32) -> (i32, i32) {
    %c0_i32 = arith.constant 0 : i32
    %c0_i32_0 = arith.constant 0 : i32
    return %arg0, %c0_i32 : i32, i32
  }
}

</mosaic_0001>

<bundles_post_ra>
// kernel: duorec_forward.1
= control target key start
LH: loop header
LB: loop body
LE: loop exit
PB: predicated region body
PF: predicated region fallthrough
CT: control target
= control target key end

     0   :  { %7 = vsyncpa [#allocation3], 0  ;;  %s3465_s0 = inlined_call_operand.hbm [shape: s32[2,8], index: 0, kind: input, shape index: {}]   ;;  %s3466_s1 = inlined_call_operand.hbm [shape: f32[448,128], index: 1, kind: input, shape index: {}]   ;;  %s3467_s2 = inlined_call_operand.vmem [shape: f32[16,128], index: 2, kind: output, shape index: {}]  }
   0x1   :  { %8 = vsyncpa [#allocation5], 0  ;;  %s3095_s9 = smov [#allocation2]   ;;  %s3096_s11 = smov [#allocation4]  }
   0x2   :  { %s15_s10 = sshll.u32 %s3095_s9, 4  ;;  %s24_s12 = sshll.u32 %s3096_s11, 4  ;;  %s16_s10 = int_to_ptr.vmem [resolvable:$true] %s15_s10  ;;  %s25_s12 = int_to_ptr.vmem [resolvable:$true] %s24_s12 }
   0x3   :  { %s3059_s13 = scalar_lea.vmem %s16_s10, 32  ;;  %p3064_p1 = scmp.lt.s32.totalorder %s16_s10, %s16_s10 }
   0x4   :  { %p3060_p0 = scmp.ne.s32.totalorder %s16_s10, %s3059_s13  ;;  %p3065_p2 = scmp.lt.s32.totalorder %s3059_s13, %s3059_s13 }
   0x6   :  { %p3066_p3 = por %p3065_p2, %p3064_p1 }
   0x8   :  { %p3067_p4 = pnand %p3066_p3, %p3060_p0 }
   0xa   :  { %3070 = shalt.err (!%p3067_p4)
}
   0xb   :  { %18 = dma.hbm_to_vmem [thread:$0]  %s3465_s0, 32, %s16_s10, [#allocation3]  }
   0xc   :  { %s3079_s16 = scalar_lea.vmem %s25_s12, 7168  ;;  %p3084_p6 = scmp.lt.s32.totalorder %s25_s12, %s25_s12 }
   0xd   :  { %p3080_p5 = scmp.ne.s32.totalorder %s25_s12, %s3079_s16  ;;  %p3085_p7 = scmp.lt.s32.totalorder %s3079_s16, %s3079_s16 }
   0xf   :  { %p3086_p8 = por %p3085_p7, %p3084_p6 }
  0x11   :  { %p3087_p9 = pnand %p3086_p8, %p3080_p5 }
  0x13   :  { %3090 = shalt.err (!%p3087_p9)
}
  0x14   :  { %s3097_s17 = smov 128   ;;  %s3098_s18 = smov 8  }
  0x15   :  { %30 = dma.hbm_to_vmem [thread:$0]  %s3466_s1, 7168, %s25_s12, [#allocation5], %s3097_s17, %s3097_s17, %s3098_s18  }
  0x16   :  { %3091 = dma.done.wait [#allocation3], 32  }
  0x17   :  { %3092 = vsyncadd [#allocation3], 4294967264 }
  0x18   :  { %3093 = dma.done.wait [#allocation5], 7168  }
  0x19   :  { %3094 = vsyncadd [#allocation5], 4294960128  ;;  %v49_v0 = vlaneseq  ;;  %v3139_v4 = vld [vmem:[#allocation2] sm:$0x3]  ;;  %v48_v5 = vld [vmem:[#allocation4 + $0x48] sm:$0xff]  ;;  %v3099_v15 = vmov 0.0  }
  0x1a   :  { %v47_v6 = vld [vmem:[#allocation4 + $0x40] sm:$0xff]  ;;  %2761 = vmatprep.subr.mxu0 %v48_v5  ;;  %v46_v8 = vld [vmem:[#allocation4 + $0x38] sm:$0xff]  ;;  %v45_v10 = vld [vmem:[#allocation4 + $0x30] sm:$0xff]  ;;  %vm71_vm0 = vcmask 523264   ;;  %vm157_vm3 = vcmask 261120   ;;  %vm3100_vm4 = vmmov 0  }
  0x1b   :  { %v3131_v1 = vshrl.u32 %v49_v0, 7  ;;  %2762 = vmatpush3.msra.mxu0 %v48_v5  ;;  %v44_v11 = vld [vmem:[#allocation4 + $0x28] sm:$0xff]  ;;  %v43_v12 = vld [vmem:[#allocation4 + $0x20] sm:$0xff]  ;;  %v42_v13 = vld [vmem:[#allocation4 + $0x18] sm:$0xff]  ;;  %v3146_v16 = vand.u32 127, %v49_v0  ;;  %s3101_s0 = smov 96  }
  0x1c   :  { %2763 = vmatprep.subr.mxu0 %v47_v6  ;;  %v41_v14 = vld [vmem:[#allocation4 + $0x10] sm:$0xff]  ;;  %v40_v25 = vld [vmem:[#allocation4 + $0x8] sm:$0xff]  ;;  %v244_v41 = vld [vmem:[#allocation4 + $0x80] sm:$0xff]  ;;  %vm351_vm5 = vcmask 130048   ;;  %vm38_vm6 = vcmp.eq.s32.totalorder %v3139_v4, 50  ;;  %vm3103_vm7 = vmmov 1  }
  0x1d   :  { %v3134_v2 = vsub.s32 0, %v3131_v1  ;;  %v3137_v3 = vsub.s32 1, %v3131_v1  ;;  %2764 = vmatpush3.msra.mxu0 %v47_v6  ;;  %v245_v40 = vld [vmem:[#allocation4 + $0x88] sm:$0xff]  ;;  %v243_v42 = vld [vmem:[#allocation4 + $0x78] sm:$0xff]  ;;  %v242_v43 = vld [vmem:[#allocation4 + $0x70] sm:$0xff]  ;;  %vm199_vm11 = vcmp.ge.s32.totalorder %v3131_v1, %v3146_v16  ;;  %vm507_vm14 = vcmask 64512  }
  0x1e   :  { %2765 = vmatprep.subr.mxu0 %v46_v8  ;;  %2780 = vmatprep.subr.mxu1 %v245_v40  ;;  %v39_v50 = vld [vmem:[#allocation4] sm:$0xff]  ;;  %v3173_v61 = vld [vmem:[#allocation4 + $0x110] sm:$0xff]  ;;  %vm200_vm8 = vmxor %vm38_vm6, %vm3103_vm7  ;;  %s3105_s1 = smov 64   ;;  %s3106_s21 = smov 80  }
  0x1f   :  { %v54_v7 = vrot.slane %v3139_v4, %v3134_v2  ;;  %v61_v9 = vrot.slane %v3139_v4, %v3137_v3  ;;  %2766 = vmatpush3.msra.mxu0 %v46_v8  ;;  %2781 = vmatpush3.msra.mxu1 %v245_v40  ;;  %v188_v51 = vrot.slane %v39_v50, %v3134_v2  ;;  %s3107_s22 = smov 112   ;;  %s3108_s23 = smov 48  }
  0x20   :  { %2767 = vmatprep.subr.mxu0 %v45_v10  ;;  %2782 = vmatprep.subr.mxu1 %v244_v41  ;;  %v194_v54 = vrot.slane %v39_v50, %v3137_v3  ;;  %v266_v63 = vrot.slane %v3173_v61, %v3134_v2  ;;  %s3109_s24 = smov 16  }
  0x21   :  { %56 = vbcast.lane.b32.xlu0 %v54_v7, 256  ;;  %2768 = vmatpush3.msra.mxu0 %v45_v10 }
  0x22   :  { %2769 = vmatprep.subr.mxu0 %v44_v11  ;;  %2783 = vmatpush3.msra.mxu1 %v244_v41 }
  0x23   :  { %2770 = vmatpush3.msra.mxu0 %v44_v11  ;;  %2784 = vmatprep.subr.mxu1 %v243_v42 }
  0x24   :  { %2771 = vmatprep.subr.mxu0 %v43_v12  ;;  %2785 = vmatpush3.msra.mxu1 %v243_v42 }
  0x25   :  { %63 = vbcast.lane.b32.xlu0 %v61_v9, 256  ;;  %2772 = vmatpush3.msra.mxu0 %v43_v12  ;;  %v3102_v9 = vmov 1966171168  }
  0x26   :  { %2773 = vmatprep.subr.mxu0 %v42_v13  ;;  %2786 = vmatprep.subr.mxu1 %v242_v43  ;;  %v203_v10 = vunpack.c.l.s4 %v3102_v9 }
  0x27   :  { %2774 = vmatpush3.msra.mxu0 %v42_v13  ;;  %2787 = vmatpush3.msra.mxu1 %v242_v43  ;;  %v3104_v13 = vmov 0  }
  0x28   :  { %2775 = vmatprep.subr.mxu0 %v41_v14  ;;  %2791 = vmatprep.subr.mxu1 %v3099_v15  ;;  %v204_v11 = vunpack.c.0.s8 %v203_v10 }
  0x29   :  { %2776 = vmatpush3.msra.mxu0 %v41_v14  ;;  %v201_v14 = vsel %vm200_vm8, 1, %v3104_v13 }
  0x2a   :  { %2811 = vmatprep.subr.mxu0 %v3099_v15  ;;  %v207_v12 = vsub.s32 %v204_v11, %v3131_v1 }
  0x93   :  { %v57_v17 = vpop.permute.xlu0 %56 }
  0x94   :  { %vm65_vm1 = vcmp.eq.s32.totalorder %v3146_v16, %v57_v17  ;;  %v208_v17 = vrot.slane %v201_v14, %v207_v12 }
  0x95   :  { %v2611_v18 = vsel %vm65_vm1, 1.0, %v3099_v15 }
  0x96   :  { %2777 = vmatprep.mubr.msk.f32.mxu0 %vm71_vm0, %v2611_v18  ;;  %v209_v18 = vcombine.high %v208_v17, %v208_v17 }
  0x97   :  { %v64_v19 = vpop.permute.xlu0 %63 }
  0x98   :  { %vm66_vm2 = vcmp.eq.s32.totalorder %v3146_v16, %v64_v19  ;;  %v216_v19 = vrot.slane %v208_v17, %v207_v12 }
  0x99   :  { %v2612_v20 = vsel %vm66_vm2, 1.0, %v3099_v15 }
  0x9a   :  { %2778 = vmatmul.mubr.msk.f32.vlgmr.msra.gmra.mxu0 %vm71_vm0, %v2612_v20  ;;  %vm224_vm9 = vcmp.ne.s32.totalorder %v216_v19, 0  ;;  %v223_v20 = vrot.slane %v209_v18, %v207_v12 }
  0x9b   :  { %2813 = vmatprep.mubr.msk.f32.mxu0 %vm3100_vm4, %v3099_v15 }
  0x9c   :  { %vm225_vm10 = vcmp.ne.s32.totalorder %v223_v20, 0 }
 0x15a   :  { %v2779_v21 = vpop.f32.mrf.mxu0 }
 0x15b   :  { %v154_v23 = vmul.f32 5.656854, %v2779_v21  ;;  %v228_v21 = vsel %vm224_vm9, 1, %v3104_v13 }
 0x15c   :  { %v144_v22 = vpop.f32.mrf.mxu0 }
 0x15d   :  { %v153_v24 = vmul.f32 5.656854, %v144_v22  ;;  %v156_v28 = vadd.f32 %v154_v23, %v40_v25  ;;  %v233_v22 = vrot.slane %v228_v21, %v3134_v2  ;;  %v229_v23 = vsel %vm225_vm10, 1, %v3104_v13 }
 0x15e   :  { %v237_v4 = vrot.slane %v229_v23, %v3134_v2 }
 0x15f   :  { %v155_v26 = vadd.f32 %v153_v24, %v40_v25  ;;  %v161_v29 = vsel %vm157_vm3, %v156_v28, 0.0  ;;  %vm238_vm12 = vcmp.eq.s32.totalorder %v233_v22, 1 }
 0x160   :  { %vm3203_vm13 = vmand %vm199_vm11, %vm238_vm12  ;;  %vm239_vm15 = vcmp.eq.s32.totalorder %v237_v4, 1 }
 0x161   :  { %v158_v27 = vsel %vm157_vm3, %v155_v26, 0.0  ;;  %vm3210_vm1 = vmand %vm199_vm11, %vm239_vm15 }
 0x162   :  { %159 = vadd.xlane.f32.xlu1 %v158_v27 }
 0x166   :  { %162 = vadd.xlane.f32.xlu1 %v161_v29 }
 0x1eb   :  { %v160_v30 = vpop.xlane.xlu1 %159 }
 0x1ec   :  { %v165_v31 = vmul.f32 0.03125, %v160_v30 }
 0x1ee   :  { %v167_v32 = vsub.f32 %v155_v26, %v165_v31 }
 0x1ef   :  { %v163_v33 = vpop.xlane.xlu1 %162 }
 0x1f0   :  { %v166_v34 = vmul.f32 0.03125, %v163_v33  ;;  %v169_v35 = vmul.f32 %v167_v32, %v167_v32 }
 0x1f2   :  { %v168_v36 = vsub.f32 %v156_v28, %v166_v34  ;;  %v171_v37 = vsel %vm157_vm3, %v169_v35, 0.0 }
 0x1f3   :  { %172 = vadd.xlane.f32.xlu0 %v171_v37 }
 0x1f4   :  { %v170_v38 = vmul.f32 %v168_v36, %v168_v36 }
 0x1f6   :  { %v174_v39 = vsel %vm157_vm3, %v170_v38, 0.0 }
 0x1f7   :  { %175 = vadd.xlane.f32.xlu1 %v174_v39 }
 0x27c   :  { %v173_v44 = vpop.xlane.xlu0 %172 }
 0x27d   :  { %v177_v45 = vmul.f32 0.03125, %v173_v44 }
 0x27f   :  { %v179_v46 = vadd.f32 1e-12, %v177_v45 }
 0x280   :  { %v176_v47 = vpop.xlane.xlu1 %175 }
 0x281   :  { %2990 = vrsqrt.f32 %v179_v46  ;;  %v178_v48 = vmul.f32 0.03125, %v176_v47 }
 0x283   :  { %v180_v49 = vadd.f32 1e-12, %v178_v48 }
 0x285   :  { %2992 = vrsqrt.f32 %v180_v49 }
 0x28e   :  { %v2991_v52 = vpop.eup %2990 }
 0x28f   :  { %v183_v53 = vmul.f32 %v2991_v52, %v167_v32 }
 0x291   :  { %v189_v55 = vmul.f32 %v188_v51, %v183_v53 }
 0x292   :  { %v2993_v56 = vpop.eup %2992 }
 0x293   :  { %v184_v57 = vmul.f32 %v2993_v56, %v168_v36  ;;  %v3161_v58 = vadd.f32 %v194_v54, %v189_v55 }
 0x295   :  { %v190_v59 = vmul.f32 %v188_v51, %v184_v57  ;;  %2788 = vmatprep.mubr.msk.f32.mxu1 %vm157_vm3, %v3161_v58 }
 0x297   :  { %v3165_v60 = vadd.f32 %v194_v54, %v190_v59 }
 0x299   :  { %2789 = vmatmul.mubr.msk.f32.vlgmr.msra.gmra.mxu1 %vm157_vm3, %v3165_v60 }
 0x29a   :  { %2793 = vmatprep.mubr.msk.f32.mxu1 %vm3100_vm4, %v3099_v15 }
 0x359   :  { %v2790_v62 = vpop.f32.mrf.mxu1 }
 0x35a   :  { %v3181_v6 = vadd.f32 %v2790_v62, %v266_v63 }
 0x35b   :  { %v339_v0 = vpop.f32.mrf.mxu1 }
 0x35c   :  { %v3177_v5 = vadd.f32 %v339_v0, %v266_v63 }
 0x35e   :  { %349 = vrot.lane.b32.xlu1 %v3177_v5, %s3101_s0 }
 0x362   :  { %427 = vrot.lane.b32.xlu1 %v3181_v6, %s3101_s0 }
 0x3d0   :  { %v350_v7 = vpop.permute.xlu1 %349 }
 0x3d1   :  { %2792 = vmatpush3.xpose.msk.msra.mxu1 %vm351_vm5, %v350_v7 }
 0x3d2   :  { %2796 = vmatprep.subr.mxu1 %v3099_v15 }
 0x3d4   :  { %2794 = vmatmul.mubr.msk.f32.vlgmr.msra.gmra.mxu1 %vm351_vm5, %v3177_v5  ;;  %v428_v8 = vpop.permute.xlu1 %427 }
 0x3d5   :  { %2797 = vmatpush3.xpose.msk.msra.mxu1 %vm351_vm5, %v428_v8  ;;  %2798 = vmatprep.mubr.msk.f32.mxu1 %vm3100_vm4, %v3099_v15 }
 0x3d6   :  { %2801 = vmatprep.subr.mxu1 %v3099_v15 }
 0x3d8   :  { %2799 = vmatmul.mubr.msk.f32.vlgmr.msra.gmra.mxu1 %vm351_vm5, %v3181_v6 }
 0x3d9   :  { %2803 = vmatprep.mubr.msk.f32.mxu1 %vm3100_vm4, %v3099_v15 }
 0x494   :  { %v422_v24 = vpop.f32.mrf.mxu1 }
 0x495   :  { %v503_v26 = vmul.f32 0.25, %v422_v24 }
 0x496   :  { %v2795_v27 = vpop.f32.mrf.mxu1 }
 0x497   :  { %v505_v28 = vsel %vm3203_vm13, %v503_v26, -1e+09 }
 0x498   :  { %v499_v29 = vpop.f32.mrf.mxu1  ;;  %v508_v30 = vsel %vm507_vm14, %v505_v28, -inf }
 0x499   :  { %v504_v31 = vmul.f32 0.25, %v499_v29  ;;  %509 = vmax.xlane.f32.xlu1 %v508_v30 }
 0x49a   :  { %v2800_v32 = vpop.f32.mrf.mxu1 }
 0x49b   :  { %v506_v33 = vsel %vm3210_vm1, %v504_v31, -1e+09 }
 0x49c   :  { %v511_v34 = vsel %vm507_vm14, %v506_v33, -inf }
 0x49d   :  { %512 = vmax.xlane.f32.xlu0 %v511_v34 }
 0x4aa   :  { %606 = vrot.lane.b32.xlu1 %v3181_v6, %s3105_s1 }
 0x4b3   :  { %530 = vrot.lane.b32.xlu0 %v3177_v5, %s3105_s1 }
 0x4b7   :  { %684 = vrot.lane.b32.xlu0 %v3177_v5, %s3106_s21 }
 0x4bb   :  { %762 = vrot.lane.b32.xlu0 %v3181_v6, %s3106_s21 }
 0x522   :  { %v510_v35 = vpop.xlane.xlu1 %509 }
 0x523   :  { %v514_v36 = vsub.f32 %v505_v28, %v510_v35 }
 0x525   :  { %v516_v37 = vmul.f32 1.442695, %v514_v36  ;;  %v248_v36 = vld [vmem:[#allocation4 + $0xa0] sm:$0xff] }
 0x526   :  { %v513_v38 = vpop.xlane.xlu0 %512  ;;  %v607_v53 = vpop.permute.xlu1 %606 }
 0x527   :  { %2994 = vpow2.f32 %v516_v37  ;;  %v515_v39 = vsub.f32 %v506_v33, %v513_v38  ;;  %v246_v37 = vld [vmem:[#allocation4 + $0x90] sm:$0xff] }
 0x529   :  { %v518_v40 = vmul.f32 1.442695, %v515_v39 }
 0x52a   :  { %v531_v41 = vpop.permute.xlu0 %530 }
 0x52b   :  { %2996 = vpow2.f32 %v518_v40  ;;  %2802 = vmatpush3.msra.mxu1 %v531_v41 }
 0x52c   :  { %2806 = vmatprep.subr.mxu1 %v3099_v15 }
 0x52e   :  { %v685_v42 = vpop.permute.xlu0 %684 }
 0x52f   :  { %2812 = vmatpush3.xpose.msk.msra.mxu0 %vm351_vm5, %v685_v42 }
 0x530   :  { %2821 = vmatprep.subr.mxu0 %v3099_v15 }
 0x532   :  { %v763_v47 = vpop.permute.xlu0 %762 }
 0x534   :  { %v2995_v43 = vpop.eup %2994 }
 0x535   :  { %v520_v44 = vsel %vm507_vm14, %v2995_v43, 0.0 }
 0x536   :  { %521 = vadd.xlane.f32.xlu0 %v520_v44 }
 0x538   :  { %v2997_v45 = vpop.eup %2996 }
 0x539   :  { %v523_v46 = vsel %vm507_vm14, %v2997_v45, 0.0 }
 0x53a   :  { %524 = vadd.xlane.f32.xlu0 %v523_v46  ;;  %v1029_v46 = vrot.slane %v3173_v61, %v3137_v3 }
 0x550   :  { %682 = vrot.lane.b32.xlu0 %v3177_v5, %s3107_s22 }
 0x554   :  { %760 = vrot.lane.b32.xlu0 %v3181_v6, %s3107_s22 }
 0x5bf   :  { %v522_v48 = vpop.xlane.xlu0 %521 }
 0x5c0   :  { %2998 = vrcp.f32 %v522_v48 }
 0x5c3   :  { %v525_v49 = vpop.xlane.xlu0 %524 }
 0x5c4   :  { %3000 = vrcp.f32 %v525_v49 }
 0x5c7   :  { %v683_v50 = vpop.permute.xlu0 %682 }
 0x5c8   :  { %2814 = vmatmul.mubr.msk.f32.vlgmr.msra.gmra.mxu0 %vm351_vm5, %v683_v50 }
 0x5c9   :  { %2823 = vmatprep.mubr.msk.f32.mxu0 %vm3100_vm4, %v3099_v15 }
 0x5cb   :  { %v761_v56 = vpop.permute.xlu0 %760 }
 0x5cd   :  { %v2999_v51 = vpop.eup %2998 }
 0x5ce   :  { %v528_v52 = vmul.f32 %v2999_v51, %v2995_v43 }
 0x5d0   :  { %2804 = vmatmul.mubr.msk.f32.vlgmr.msra.gmra.mxu1 %vm507_vm14, %v528_v52 }
 0x5d1   :  { %v3001_v54 = vpop.eup %3000  ;;  %2807 = vmatpush3.msra.mxu1 %v607_v53  ;;  %2808 = vmatprep.mubr.msk.f32.mxu1 %vm3100_vm4, %v3099_v15 }
 0x5d2   :  { %2816 = vmatprep.subr.mxu1 %v3099_v15  ;;  %v529_v55 = vmul.f32 %v3001_v54, %v2997_v45 }
 0x5d4   :  { %2809 = vmatmul.mubr.msk.f32.vlgmr.msra.gmra.mxu1 %vm507_vm14, %v529_v55 }
 0x5d5   :  { %2817 = vmatpush3.xpose.msk.msra.mxu1 %vm351_vm5, %v763_v47  ;;  %2818 = vmatprep.mubr.msk.f32.mxu1 %vm3100_vm4, %v3099_v15 }
 0x5d6   :  { %2826 = vmatprep.subr.mxu1 %v3099_v15 }
 0x5d8   :  { %2819 = vmatmul.mubr.msk.f32.vlgmr.msra.gmra.mxu1 %vm351_vm5, %v761_v56 }
 0x5d9   :  { %2828 = vmatprep.mubr.msk.f32.mxu1 %vm3100_vm4, %v3099_v15 }
 0x688   :  { %v756_v57 = vpop.f32.mrf.mxu0 }
 0x689   :  { %v838_v59 = vmul.f32 0.25, %v756_v57 }
 0x68a   :  { %v2815_v62 = vpop.f32.mrf.mxu0 }
 0x68b   :  { %v840_v63 = vsel %vm3203_vm13, %v838_v59, -1e+09 }
 0x68c   :  { %v842_v0 = vsel %vm507_vm14, %v840_v63, -inf }
 0x68d   :  { %843 = vmax.xlane.f32.xlu1 %v842_v0 }
 0x690   :  { %v602_v7 = vpop.f32.mrf.mxu1 }
 0x692   :  { %v2805_v8 = vpop.f32.mrf.mxu1 }
 0x694   :  { %v3252_v9 = vpop.f32.mrf.mxu1 }
 0x696   :  { %v2810_v10 = vpop.f32.mrf.mxu1 }
 0x697   :  { %v251_v10 = vld [vmem:[#allocation4 + $0xb8] sm:$0xff] }
 0x698   :  { %v834_v11 = vpop.f32.mrf.mxu1 }
 0x699   :  { %v839_v12 = vmul.f32 0.25, %v834_v11  ;;  %v250_v11 = vld [vmem:[#allocation4 + $0xb0] sm:$0xff] }
 0x69a   :  { %v2820_v13 = vpop.f32.mrf.mxu1 }
 0x69b   :  { %v841_v14 = vsel %vm3210_vm1, %v839_v12, -1e+09 }
 0x69c   :  { %v845_v17 = vsel %vm507_vm14, %v841_v14, -inf }
 0x69d   :  { %846 = vmax.xlane.f32.xlu0 %v845_v17 }
 0x716   :  { %v844_v18 = vpop.xlane.xlu1 %843 }
 0x717   :  { %v848_v19 = vsub.f32 %v840_v63, %v844_v18 }
 0x719   :  { %v850_v20 = vmul.f32 1.442695, %v848_v19 }
 0x71b   :  { %3002 = vpow2.f32 %v850_v20  ;;  %v1141_v20 = vsub.s32 4, %v3131_v1 }
 0x726   :  { %v847_v21 = vpop.xlane.xlu0 %846 }
 0x727   :  { %v849_v22 = vsub.f32 %v841_v14, %v847_v21 }
 0x728   :  { %v3003_v23 = vpop.eup %3002 }
 0x729   :  { %v852_v4 = vmul.f32 1.442695, %v849_v22  ;;  %v854_v24 = vsel %vm507_vm14, %v3003_v23, 0.0  ;;  %v1142_v22 = vrot.slane %v3173_v61, %v1141_v20 }
 0x72a   :  { %855 = vadd.xlane.f32.xlu0 %v854_v24 }
 0x72b   :  { %3004 = vpow2.f32 %v852_v4 }
 0x738   :  { %v3005_v26 = vpop.eup %3004 }
 0x739   :  { %v857_v27 = vsel %vm507_vm14, %v3005_v26, 0.0 }
 0x73a   :  { %858 = vadd.xlane.f32.xlu1 %v857_v27 }
 0x740   :  { %864 = vrot.lane.b32.xlu0 %v3177_v5, %s3108_s23  ;;  %v249_v5 = vld [vmem:[#allocation4 + $0xa8] sm:$0xff] }
 0x74b   :  { %940 = vrot.lane.b32.xlu1 %v3181_v6, %s3108_s23  ;;  %v247_v6 = vld [vmem:[#allocation4 + $0x98] sm:$0xff] }
 0x7b3   :  { %v856_v28 = vpop.xlane.xlu0 %855 }
 0x7b4   :  { %3006 = vrcp.f32 %v856_v28 }
 0x7b7   :  { %v865_v29 = vpop.permute.xlu0 %864 }
 0x7b8   :  { %2822 = vmatpush3.msra.mxu0 %v865_v29 }
 0x7b9   :  { %2831 = vmatprep.subr.mxu0 %v249_v5 }
 0x7c1   :  { %v3007_v30 = vpop.eup %3006 }
 0x7c2   :  { %v862_v31 = vmul.f32 %v3007_v30, %v3003_v23  ;;  %v1147_v23 = vsub.s32 5, %v3131_v1 }
 0x7c3   :  { %v859_v32 = vpop.xlane.xlu1 %858 }
 0x7c4   :  { %3008 = vrcp.f32 %v859_v32  ;;  %2824 = vmatmul.mubr.msk.f32.vlgmr.msra.gmra.mxu0 %vm507_vm14, %v862_v31  ;;  %v1148_v28 = vrot.slane %v3173_v61, %v1147_v23  ;;  %v261_v32 = vld [vmem:[#allocation4 + $0x108] sm:$0xff] }
 0x7c5   :  { %2832 = vmatpush3.msra.mxu0 %v249_v5  ;;  %v257_v5 = vld [vmem:[#allocation4 + $0xe8] sm:$0xff] }
 0x7c6   :  { %2833 = vmatprep.subr.mxu0 %v248_v36 }
 0x7c7   :  { %v941_v33 = vpop.permute.xlu1 %940  ;;  %2834 = vmatpush3.msra.mxu0 %v248_v36  ;;  %v256_v36 = vld [vmem:[#allocation4 + $0xe0] sm:$0xff] }
 0x7c8   :  { %2827 = vmatpush3.msra.mxu1 %v941_v33  ;;  %2835 = vmatprep.subr.mxu0 %v247_v6  ;;  %v260_v33 = vld [vmem:[#allocation4 + $0x100] sm:$0xff] }
 0x7c9   :  { %2836 = vmatpush3.msra.mxu0 %v247_v6  ;;  %v255_v6 = vld [vmem:[#allocation4 + $0xd8] sm:$0xff] }
 0x7ca   :  { %2837 = vmatprep.subr.mxu0 %v246_v37 }
 0x7cb   :  { %2838 = vmatpush3.msra.mxu0 %v246_v37  ;;  %v254_v37 = vld [vmem:[#allocation4 + $0xd0] sm:$0xff] }
 0x7cc   :  { %2853 = vmatprep.subr.mxu0 %v261_v32 }
 0x7d1   :  { %v3009_v34 = vpop.eup %3008 }
 0x7d2   :  { %v863_v35 = vmul.f32 %v3009_v34, %v3005_v26  ;;  %v259_v34 = vld [vmem:[#allocation4 + $0xf8] sm:$0xff] }
 0x7d4   :  { %2829 = vmatmul.mubr.msk.f32.vlgmr.msra.gmra.mxu1 %vm507_vm14, %v863_v35  ;;  %v258_v35 = vld [vmem:[#allocation4 + $0xf0] sm:$0xff] }
 0x884   :  { %v936_v38 = vpop.f32.mrf.mxu0 }
 0x885   :  { %1018 = vrot.lane.b32.xlu1 %v936_v38, %s3109_s24  ;;  %v3298_v38 = vsub.s32 2, %v3131_v1 }
 0x886   :  { %v2825_v39 = vpop.f32.mrf.mxu0 }
 0x887   :  { %v1154_v39 = vrot.slane %v3173_v61, %v3298_v38 }
 0x894   :  { %v1012_v40 = vpop.f32.mrf.mxu1 }
 0x895   :  { %1020 = vrot.lane.b32.xlu0 %v1012_v40, %s3109_s24 }
 0x896   :  { %v2830_v41 = vpop.f32.mrf.mxu1 }
 0x8f7   :  { %v1019_v42 = vpop.permute.xlu1 %1018 }
 0x8f8   :  { %v1024_v43 = vsel %vm351_vm5, %v602_v7, %v1019_v42 }
 0x8f9   :  { %2839 = vmatprep.mubr.msk.f32.mxu0 %vm157_vm3, %v1024_v43 }
 0x907   :  { %v1021_v44 = vpop.permute.xlu0 %1020 }
 0x908   :  { %v1025_v45 = vsel %vm351_vm5, %v3252_v9, %v1021_v44  ;;  %v253_v9 = vld [vmem:[#allocation4 + $0xc8] sm:$0xff] }
 0x909   :  { %2840 = vmatmul.mubr.msk.f32.vlgmr.msra.gmra.mxu0 %vm157_vm3, %v1025_v45  ;;  %2842 = vmatprep.subr.mxu1 %v253_v9 }
 0x90a   :  { %2843 = vmatpush3.msra.mxu1 %v253_v9  ;;  %2854 = vmatpush3.msra.mxu0 %v261_v32  ;;  %v1379_v32 = vld [vmem:[#allocation4 + $0x118] sm:$0xff] }
 0x90b   :  { %2855 = vmatprep.subr.mxu0 %v260_v33 }
 0x90c   :  { %2856 = vmatpush3.msra.mxu0 %v260_v33 }
 0x90d   :  { %2857 = vmatprep.subr.mxu0 %v259_v34 }
 0x90e   :  { %2858 = vmatpush3.msra.mxu0 %v259_v34 }
 0x90f   :  { %2859 = vmatprep.subr.mxu0 %v258_v35 }
 0x910   :  { %2860 = vmatpush3.msra.mxu0 %v258_v35 }
 0x911   :  { %2861 = vmatprep.subr.mxu0 %v257_v5 }
 0x912   :  { %2862 = vmatpush3.msra.mxu0 %v257_v5 }
 0x913   :  { %2863 = vmatprep.subr.mxu0 %v256_v36 }
 0x914   :  { %2864 = vmatpush3.msra.mxu0 %v256_v36 }
 0x915   :  { %2865 = vmatprep.subr.mxu0 %v255_v6 }
 0x916   :  { %2866 = vmatpush3.msra.mxu0 %v255_v6 }
 0x917   :  { %2867 = vmatprep.subr.mxu0 %v254_v37 }
 0x918   :  { %2868 = vmatpush3.msra.mxu0 %v254_v37  ;;  %v1369_v37 = vsub.s32 6, %v3131_v1 }
 0x919   :  { %2893 = vmatprep.subr.mxu0 %v3099_v15 }
 0x9c9   :  { %v2841_v47 = vpop.f32.mrf.mxu0 }
 0x9ca   :  { %v1108_v48 = vadd.f32 %v2841_v47, %v1029_v46 }
 0x9cb   :  { %v1102_v49 = vpop.f32.mrf.mxu0 }
 0x9cc   :  { %v1103_v50 = vadd.f32 %v1102_v49, %v1029_v46  ;;  %v1112_v51 = vadd.f32 %v1108_v48, %v3165_v60 }
 0x9ce   :  { %v1116_v52 = vsel %vm157_vm3, %v1112_v51, 0.0  ;;  %v1111_v53 = vadd.f32 %v1103_v50, %v3161_v58  ;;  %v252_v58 = vld [vmem:[#allocation4 + $0xc0] sm:$0xff] }
 0x9cf   :  { %1117 = vadd.xlane.f32.xlu0 %v1116_v52  ;;  %2844 = vmatprep.subr.mxu1 %v252_v58 }
 0x9d0   :  { %v1113_v54 = vsel %vm157_vm3, %v1111_v53, 0.0  ;;  %2845 = vmatpush3.msra.mxu1 %v252_v58 }
 0x9d1   :  { %1114 = vadd.xlane.f32.xlu1 %v1113_v54  ;;  %2846 = vmatprep.subr.mxu1 %v251_v10 }
 0x9d2   :  { %2847 = vmatpush3.msra.mxu1 %v251_v10 }
 0x9d3   :  { %2848 = vmatprep.subr.mxu1 %v250_v11 }
 0x9d4   :  { %2849 = vmatpush3.msra.mxu1 %v250_v11 }
 0xa58   :  { %v1118_v55 = vpop.xlane.xlu0 %1117 }
 0xa59   :  { %v1120_v56 = vmul.f32 0.03125, %v1118_v55 }
 0xa5a   :  { %v1115_v57 = vpop.xlane.xlu1 %1114 }
 0xa5b   :  { %v1122_v59 = vsub.f32 %v1112_v51, %v1120_v56  ;;  %v1119_v62 = vmul.f32 0.03125, %v1115_v57 }
 0xa5d   :  { %v1121_v63 = vsub.f32 %v1111_v53, %v1119_v62  ;;  %v1124_v0 = vmul.f32 %v1122_v59, %v1122_v59 }
 0xa5f   :  { %v1128_v7 = vsel %vm157_vm3, %v1124_v0, 0.0  ;;  %v1123_v8 = vmul.f32 %v1121_v63, %v1121_v63 }
 0xa60   :  { %1129 = vadd.xlane.f32.xlu1 %v1128_v7  ;;  %v1256_v7 = vsub.s32 3, %v3131_v1 }
 0xa61   :  { %v1125_v60 = vsel %vm157_vm3, %v1123_v8, 0.0 }
 0xa62   :  { %1126 = vadd.xlane.f32.xlu0 %v1125_v60  ;;  %v1257_v8 = vrot.slane %v3173_v61, %v1256_v7 }
 0xae9   :  { %v1130_v12 = vpop.xlane.xlu1 %1129 }
 0xaea   :  { %v1132_v13 = vmul.f32 0.03125, %v1130_v12 }
 0xaeb   :  { %v1127_v14 = vpop.xlane.xlu0 %1126 }
 0xaec   :  { %v1134_v17 = vadd.f32 1e-12, %v1132_v13  ;;  %v1131_v18 = vmul.f32 0.03125, %v1127_v14 }
 0xaee   :  { %3010 = vrsqrt.f32 %v1134_v17  ;;  %v1133_v19 = vadd.f32 1e-12, %v1131_v18 }
 0xaf0   :  { %3012 = vrsqrt.f32 %v1133_v19 }
 0xafb   :  { %v3011_v21 = vpop.eup %3010 }
 0xafc   :  { %v1138_v4 = vmul.f32 %v3011_v21, %v1122_v59 }
 0xafd   :  { %v3013_v24 = vpop.eup %3012 }
 0xafe   :  { %v1137_v26 = vmul.f32 %v3013_v24, %v1121_v63  ;;  %v1144_v27 = vmul.f32 %v1142_v22, %v1138_v4 }
 0xb00   :  { %v1143_v29 = vmul.f32 %v1142_v22, %v1137_v26  ;;  %v3290_v31 = vadd.f32 %v1148_v28, %v1144_v27 }
 0xb02   :  { %v3288_v30 = vadd.f32 %v1148_v28, %v1143_v29  ;;  %v1382_v29 = vld [vmem:[#allocation4 + $0x130] sm:$0xff] }
 0xb03   :  { %2872 = vmatprep.subr.mxu1 %v1382_v29 }
 0xb04   :  { %2850 = vmatprep.mubr.msk.f32.mxu1 %vm157_vm3, %v3288_v30 }
 0xb05   :  { %2851 = vmatmul.mubr.msk.f32.vlgmr.msra.gmra.mxu1 %vm157_vm3, %v3290_v31 }
 0xb06   :  { %2873 = vmatpush3.msra.mxu1 %v1382_v29 }
 0xbc5   :  { %v2852_v40 = vpop.f32.mrf.mxu1 }
 0xbc6   :  { %v1233_v41 = vadd.f32 %v2852_v40, %v1154_v39  ;;  %v1370_v40 = vrot.slane %v3173_v61, %v1369_v37 }
 0xbc7   :  { %v1227_v42 = vpop.f32.mrf.mxu1 }
 0xbc8   :  { %v1237_v43 = vmul.f32 %v1233_v41, %v1233_v41  ;;  %v1228_v44 = vadd.f32 %v1227_v42, %v1154_v39 }
 0xbca   :  { %v1239_v45 = vmul.f32 %v1237_v43, %v1233_v41  ;;  %v1236_v46 = vmul.f32 %v1228_v44, %v1228_v44 }
 0xbcc   :  { %v1241_v47 = vmul.f32 0.044715, %v1239_v45  ;;  %v1238_v48 = vmul.f32 %v1236_v46, %v1228_v44 }
 0xbce   :  { %v1243_v49 = vadd.f32 %v1241_v47, %v1233_v41  ;;  %v1240_v50 = vmul.f32 0.044715, %v1238_v48 }
 0xbd0   :  { %v1245_v51 = vmul.f32 0.7978846, %v1243_v49  ;;  %v1242_v52 = vadd.f32 %v1240_v50, %v1228_v44  ;;  %v3335_v50 = vld [vmem:[#allocation4 + $0x1b8] sm:$0xff] }
 0xbd2   :  { %3014 = vtanh.f32 %v1245_v51  ;;  %v1244_v53 = vmul.f32 0.7978846, %v1242_v52  ;;  %v1403_v51 = vrot.slane %v3335_v50, %v3134_v2 }
 0xbd4   :  { %3016 = vtanh.f32 %v1244_v53 }
 0xbdf   :  { %v3015_v54 = vpop.eup %3014 }
 0xbe0   :  { %v1249_v55 = vadd.f32 1.0, %v3015_v54 }
 0xbe1   :  { %v3017_v56 = vpop.eup %3016 }
 0xbe2   :  { %v1248_v57 = vadd.f32 1.0, %v3017_v56  ;;  %v1251_v59 = vmul.f32 0.5, %v1249_v55 }
 0xbe4   :  { %v1250_v62 = vmul.f32 0.5, %v1248_v57  ;;  %v1253_v0 = vmul.f32 %v1251_v59, %v1233_v41  ;;  %v1375_v41 = vsub.s32 7, %v3131_v1 }
 0xbe6   :  { %v1252_v63 = vmul.f32 %v1250_v62, %v1228_v44  ;;  %v1376_v46 = vrot.slane %v3173_v61, %v1375_v41 }
 0xbe8   :  { %2869 = vmatprep.mubr.msk.f32.mxu0 %vm71_vm0, %v1252_v63 }
 0xbe9   :  { %2870 = vmatmul.mubr.msk.f32.vlgmr.msra.gmra.mxu0 %vm71_vm0, %v1253_v0 }
 0xbea   :  { %2895 = vmatprep.mubr.msk.f32.mxu0 %vm3100_vm4, %v3099_v15 }
 0xca9   :  { %v2871_v60 = vpop.f32.mrf.mxu0 }
 0xcaa   :  { %v1336_v9 = vadd.f32 %v2871_v60, %v1257_v8 }
 0xcab   :  { %v1330_v58 = vpop.f32.mrf.mxu0 }
 0xcac   :  { %v1331_v10 = vadd.f32 %v1330_v58, %v1257_v8  ;;  %v1340_v11 = vadd.f32 %v1336_v9, %v3290_v31  ;;  %v1380_v31 = vld [vmem:[#allocation4 + $0x120] sm:$0xff] }
 0xcae   :  { %v1344_v12 = vsel %vm157_vm3, %v1340_v11, 0.0  ;;  %v1339_v13 = vadd.f32 %v1331_v10, %v3288_v30  ;;  %v1381_v30 = vld [vmem:[#allocation4 + $0x128] sm:$0xff] }
 0xcaf   :  { %1345 = vadd.xlane.f32.xlu1 %v1344_v12  ;;  %2874 = vmatprep.subr.mxu1 %v1381_v30 }
 0xcb0   :  { %v1341_v14 = vsel %vm157_vm3, %v1339_v13, 0.0  ;;  %2875 = vmatpush3.msra.mxu1 %v1381_v30 }
 0xcb1   :  { %1342 = vadd.xlane.f32.xlu0 %v1341_v14  ;;  %2876 = vmatprep.subr.mxu1 %v1380_v31 }
 0xcb2   :  { %2877 = vmatpush3.msra.mxu1 %v1380_v31 }
 0xcb3   :  { %2878 = vmatprep.subr.mxu1 %v1379_v32 }
 0xcb4   :  { %2879 = vmatpush3.msra.mxu1 %v1379_v32 }
 0xcb5   :  { %2883 = vmatprep.subr.mxu1 %v3099_v15 }
 0xd38   :  { %v1346_v17 = vpop.xlane.xlu1 %1345 }
 0xd39   :  { %v1348_v18 = vmul.f32 0.03125, %v1346_v17 }
 0xd3a   :  { %v1343_v19 = vpop.xlane.xlu0 %1342 }
 0xd3b   :  { %v1350_v21 = vsub.f32 %v1340_v11, %v1348_v18  ;;  %v1347_v22 = vmul.f32 0.03125, %v1343_v19 }
 0xd3d   :  { %v1349_v4 = vsub.f32 %v1339_v13, %v1347_v22  ;;  %v1352_v24 = vmul.f32 %v1350_v21, %v1350_v21 }
 0xd3f   :  { %v1356_v26 = vsel %vm157_vm3, %v1352_v24, 0.0  ;;  %v1351_v27 = vmul.f32 %v1349_v4, %v1349_v4 }
 0xd40   :  { %1357 = vadd.xlane.f32.xlu1 %v1356_v26 }
 0xd41   :  { %v1353_v28 = vsel %vm157_vm3, %v1351_v27, 0.0 }
 0xd42   :  { %1354 = vadd.xlane.f32.xlu0 %v1353_v28 }
 0xdc9   :  { %v1358_v33 = vpop.xlane.xlu1 %1357 }
 0xdca   :  { %v1360_v34 = vmul.f32 0.03125, %v1358_v33 }
 0xdcb   :  { %v1355_v35 = vpop.xlane.xlu0 %1354 }
 0xdcc   :  { %v1362_v5 = vadd.f32 1e-12, %v1360_v34  ;;  %v1359_v36 = vmul.f32 0.03125, %v1355_v35 }
 0xdce   :  { %3018 = vrsqrt.f32 %v1362_v5  ;;  %v1361_v6 = vadd.f32 1e-12, %v1359_v36 }
 0xdd0   :  { %3020 = vrsqrt.f32 %v1361_v6 }
 0xddb   :  { %v3019_v39 = vpop.eup %3018 }
 0xddc   :  { %v1366_v42 = vmul.f32 %v3019_v39, %v1350_v21 }
 0xddd   :  { %v3021_v43 = vpop.eup %3020 }
 0xdde   :  { %v1365_v44 = vmul.f32 %v3021_v43, %v1349_v4  ;;  %v1372_v45 = vmul.f32 %v1370_v40, %v1366_v42 }
 0xde0   :  { %v1371_v47 = vmul.f32 %v1370_v40, %v1365_v44  ;;  %v3327_v49 = vadd.f32 %v1376_v46, %v1372_v45 }
 0xde2   :  { %v3325_v48 = vadd.f32 %v1376_v46, %v1371_v47 }
 0xde4   :  { %2880 = vmatprep.mubr.msk.f32.mxu1 %vm157_vm3, %v3325_v48 }
 0xde5   :  { %2881 = vmatmul.mubr.msk.f32.vlgmr.msra.gmra.mxu1 %vm157_vm3, %v3327_v49 }
 0xde6   :  { %2885 = vmatprep.mubr.msk.f32.mxu1 %vm3100_vm4, %v3099_v15 }
 0xea5   :  { %v2882_v61 = vpop.f32.mrf.mxu1 }
 0xea6   :  { %v3339_v52 = vadd.f32 %v2882_v61, %v1403_v51 }
 0xea7   :  { %v1476_v53 = vpop.f32.mrf.mxu1 }
 0xea8   :  { %v3341_v54 = vadd.f32 %v1476_v53, %v1403_v51  ;;  %1563 = vrot.lane.b32.xlu1 %v3339_v52, %s3101_s0 }
 0xeaa   :  { %1486 = vrot.lane.b32.xlu0 %v3341_v54, %s3101_s0 }
 0xf1a   :  { %v1564_v56 = vpop.permute.xlu1 %1563 }
 0xf1c   :  { %v1487_v55 = vpop.permute.xlu0 %1486 }
 0xf1d   :  { %2884 = vmatpush3.xpose.msk.msra.mxu1 %vm351_vm5, %v1487_v55 }
 0xf1e   :  { %2888 = vmatprep.subr.mxu1 %v3099_v15 }
 0xf20   :  { %2886 = vmatmul.mubr.msk.f32.vlgmr.msra.gmra.mxu1 %vm351_vm5, %v3341_v54 }
 0xf21   :  { %2889 = vmatpush3.xpose.msk.msra.mxu1 %vm351_vm5, %v1564_v56  ;;  %2890 = vmatprep.mubr.msk.f32.mxu1 %vm3100_vm4, %v3099_v15 }
 0xf22   :  { %2898 = vmatprep.subr.mxu1 %v3099_v15 }
 0xf24   :  { %2891 = vmatmul.mubr.msk.f32.vlgmr.msra.gmra.mxu1 %vm351_vm5, %v3339_v52 }
 0xf25   :  { %2900 = vmatprep.mubr.msk.f32.mxu1 %vm3100_vm4, %v3099_v15 }
 0xfe0   :  { %v1558_v2 = vpop.f32.mrf.mxu1 }
 0xfe1   :  { %v1639_v57 = vmul.f32 0.25, %v1558_v2 }
 0xfe2   :  { %v2887_v59 = vpop.f32.mrf.mxu1 }
 0xfe3   :  { %v1641_v62 = vsel %vm3203_vm13, %v1639_v57, -1e+09 }
 0xfe4   :  { %v1635_v63 = vpop.f32.mrf.mxu1  ;;  %v1643_v0 = vsel %vm507_vm14, %v1641_v62, -inf }
 0xfe5   :  { %v1640_v8 = vmul.f32 0.25, %v1635_v63  ;;  %1644 = vmax.xlane.f32.xlu1 %v1643_v0 }
 0xfe6   :  { %v2892_v60 = vpop.f32.mrf.mxu1 }
 0xfe7   :  { %v1642_v9 = vsel %vm3210_vm1, %v1640_v8, -1e+09 }
 0xfe8   :  { %v1646_v58 = vsel %vm507_vm14, %v1642_v9, -inf }
 0xfe9   :  { %1647 = vmax.xlane.f32.xlu0 %v1646_v58 }
 0xff6   :  { %1741 = vrot.lane.b32.xlu1 %v3339_v52, %s3105_s1 }
 0xffa   :  { %1819 = vrot.lane.b32.xlu1 %v3341_v54, %s3106_s21 }
 0xfff   :  { %1665 = vrot.lane.b32.xlu0 %v3341_v54, %s3105_s1 }
0x106e   :  { %v1645_v10 = vpop.xlane.xlu1 %1644 }
0x106f   :  { %v1649_v11 = vsub.f32 %v1641_v62, %v1645_v10 }
0x1071   :  { %v1651_v12 = vmul.f32 1.442695, %v1649_v11 }
0x1072   :  { %v1742_v13 = vpop.permute.xlu1 %1741  ;;  %v1648_v14 = vpop.xlane.xlu0 %1647 }
0x1073   :  { %3022 = vpow2.f32 %v1651_v12  ;;  %v1650_v17 = vsub.f32 %v1642_v9, %v1648_v14  ;;  %2899 = vmatpush3.msra.mxu1 %v1742_v13  ;;  %v1385_v13 = vld [vmem:[#allocation4 + $0x148] sm:$0xff]  ;;  %v1383_v14 = vld [vmem:[#allocation4 + $0x138] sm:$0xff] }
0x1074   :  { %2908 = vmatprep.subr.mxu1 %v3099_v15 }
0x1075   :  { %v1653_v18 = vmul.f32 1.442695, %v1650_v17 }
0x1076   :  { %v1666_v19 = vpop.permute.xlu0 %1665  ;;  %v1820_v26 = vpop.permute.xlu1 %1819 }
0x1077   :  { %3024 = vpow2.f32 %v1653_v18  ;;  %2894 = vmatpush3.msra.mxu0 %v1666_v19 }
0x1078   :  { %2903 = vmatprep.subr.mxu0 %v3099_v15 }
0x1080   :  { %v3023_v21 = vpop.eup %3022 }
0x1081   :  { %v1655_v22 = vsel %vm507_vm14, %v3023_v21, 0.0 }
0x1082   :  { %1656 = vadd.xlane.f32.xlu0 %v1655_v22 }
0x1084   :  { %v3025_v4 = vpop.eup %3024 }
0x1085   :  { %v1658_v24 = vsel %vm507_vm14, %v3025_v4, 0.0 }
0x1086   :  { %1659 = vadd.xlane.f32.xlu1 %v1658_v24 }
0x1097   :  { %1817 = vrot.lane.b32.xlu1 %v3341_v54, %s3107_s22 }
0x1098   :  { %1897 = vrot.lane.b32.xlu0 %v3339_v52, %s3106_s21 }
0x109c   :  { %1895 = vrot.lane.b32.xlu0 %v3339_v52, %s3107_s22 }
0x110b   :  { %v1657_v27 = vpop.xlane.xlu0 %1656 }
0x110c   :  { %3026 = vrcp.f32 %v1657_v27  ;;  %v2164_v27 = vrot.slane %v3335_v50, %v3137_v3 }
0x110f   :  { %v1660_v28 = vpop.xlane.xlu1 %1659  ;;  %v1898_v32 = vpop.permute.xlu0 %1897 }
0x1110   :  { %3028 = vrcp.f32 %v1660_v28 }
0x1113   :  { %v1818_v34 = vpop.permute.xlu1 %1817  ;;  %v1896_v35 = vpop.permute.xlu0 %1895 }
0x1119   :  { %v3027_v29 = vpop.eup %3026 }
0x111a   :  { %v1663_v30 = vmul.f32 %v3027_v29, %v3023_v21 }
0x111c   :  { %2896 = vmatmul.mubr.msk.f32.vlgmr.msra.gmra.mxu0 %vm507_vm14, %v1663_v30 }
0x111d   :  { %v3029_v31 = vpop.eup %3028  ;;  %2904 = vmatpush3.xpose.msk.msra.mxu0 %vm351_vm5, %v1820_v26  ;;  %2905 = vmatprep.mubr.msk.f32.mxu0 %vm3100_vm4, %v3099_v15 }
0x111e   :  { %v1664_v33 = vmul.f32 %v3029_v31, %v3025_v4  ;;  %2913 = vmatprep.subr.mxu0 %v3099_v15 }
0x1120   :  { %2901 = vmatmul.mubr.msk.f32.vlgmr.msra.gmra.mxu1 %vm507_vm14, %v1664_v33  ;;  %2906 = vmatmul.mubr.msk.f32.vlgmr.msra.gmra.mxu0 %vm351_vm5, %v1818_v34 }
0x1121   :  { %2909 = vmatpush3.xpose.msk.msra.mxu1 %vm351_vm5, %v1898_v32  ;;  %2910 = vmatprep.mubr.msk.f32.mxu1 %vm3100_vm4, %v3099_v15 }
0x1122   :  { %2918 = vmatprep.subr.mxu1 %v3099_v15  ;;  %2915 = vmatprep.mubr.msk.f32.mxu0 %vm3100_vm4, %v3099_v15 }
0x1124   :  { %2911 = vmatmul.mubr.msk.f32.vlgmr.msra.gmra.mxu1 %vm351_vm5, %v1896_v35 }
0x1125   :  { %2920 = vmatprep.mubr.msk.f32.mxu1 %vm3100_vm4, %v3099_v15 }
0x11dc   :  { %v3397_v5 = vpop.f32.mrf.mxu0 }
0x11de   :  { %v2897_v36 = vpop.f32.mrf.mxu0 }
0x11e0   :  { %v3399_v6 = vpop.f32.mrf.mxu1  ;;  %v1891_v39 = vpop.f32.mrf.mxu0 }
0x11e1   :  { %v1973_v40 = vmul.f32 0.25, %v1891_v39 }
0x11e2   :  { %v2902_v42 = vpop.f32.mrf.mxu1  ;;  %v2907_v43 = vpop.f32.mrf.mxu0 }
0x11e3   :  { %v1975_v44 = vsel %vm3203_vm13, %v1973_v40, -1e+09 }
0x11e4   :  { %v1969_v45 = vpop.f32.mrf.mxu1  ;;  %v1977_v46 = vsel %vm507_vm14, %v1975_v44, -inf }
0x11e5   :  { %v1974_v47 = vmul.f32 0.25, %v1969_v45  ;;  %1978 = vmax.xlane.f32.xlu1 %v1977_v46  ;;  %v1390_v45 = vld [vmem:[#allocation4 + $0x170] sm:$0xff]  ;;  %v1388_v46 = vld [vmem:[#allocation4 + $0x160] sm:$0xff] }
0x11e6   :  { %v2912_v51 = vpop.f32.mrf.mxu1 }
0x11e7   :  { %v1976_v15 = vsel %vm3210_vm1, %v1974_v47, -1e+09  ;;  %v1387_v47 = vld [vmem:[#allocation4 + $0x158] sm:$0xff] }
0x11e8   :  { %v1980_v61 = vsel %vm507_vm14, %v1976_v15, -inf }
0x11e9   :  { %1981 = vmax.xlane.f32.xlu0 %v1980_v61 }
0x126e   :  { %v1979_v53 = vpop.xlane.xlu1 %1978 }
0x126f   :  { %v1983_v55 = vsub.f32 %v1975_v44, %v1979_v53 }
0x1271   :  { %v1985_v56 = vmul.f32 1.442695, %v1983_v55 }
0x1272   :  { %v1982_v2 = vpop.xlane.xlu0 %1981 }
0x1273   :  { %3030 = vpow2.f32 %v1985_v56  ;;  %v1984_v57 = vsub.f32 %v1976_v15, %v1982_v2 }
0x1275   :  { %v1987_v25 = vmul.f32 1.442695, %v1984_v57  ;;  %v2277_v57 = vrot.slane %v3335_v50, %v1141_v20  ;;  %v1396_v20 = vld [vmem:[#allocation4 + $0x1a0] sm:$0xff] }
0x1277   :  { %3032 = vpow2.f32 %v1987_v25 }
0x1280   :  { %v3031_v59 = vpop.eup %3030 }
0x1281   :  { %v1989_v62 = vsel %vm507_vm14, %v3031_v59, 0.0 }
0x1282   :  { %1990 = vadd.xlane.f32.xlu0 %v1989_v62 }
0x1284   :  { %v3033_v63 = vpop.eup %3032 }
0x1285   :  { %v1992_v0 = vsel %vm507_vm14, %v3033_v63, 0.0 }
0x1286   :  { %1993 = vadd.xlane.f32.xlu1 %v1992_v0  ;;  %v2283_v0 = vrot.slane %v3335_v50, %v1147_v23  ;;  %v1394_v23 = vld [vmem:[#allocation4 + $0x190] sm:$0xff] }
0x1297   :  { %2075 = vrot.lane.b32.xlu1 %v3339_v52, %s3108_s23  ;;  %v1386_v52 = vld [vmem:[#allocation4 + $0x150] sm:$0xff] }
0x1298   :  { %1999 = vrot.lane.b32.xlu0 %v3341_v54, %s3108_s23  ;;  %v1384_v54 = vld [vmem:[#allocation4 + $0x140] sm:$0xff] }
0x130b   :  { %v1991_v16 = vpop.xlane.xlu0 %1990 }
0x130c   :  { %3034 = vrcp.f32 %v1991_v16 }
0x130f   :  { %v1994_v8 = vpop.xlane.xlu1 %1993  ;;  %v2000_v60 = vpop.permute.xlu0 %1999 }
0x1310   :  { %3036 = vrcp.f32 %v1994_v8  ;;  %2914 = vmatpush3.msra.mxu0 %v2000_v60 }
0x1311   :  { %2923 = vmatprep.subr.mxu0 %v1386_v52 }
0x1313   :  { %v2076_v9 = vpop.permute.xlu1 %2075 }
0x1314   :  { %2919 = vmatpush3.msra.mxu1 %v2076_v9  ;;  %v1398_v9 = vld [vmem:[#allocation4 + $0x1b0] sm:$0xff] }
0x1315   :  { %2934 = vmatprep.subr.mxu1 %v1390_v45 }
0x1319   :  { %v3035_v58 = vpop.eup %3034 }
0x131a   :  { %v1997_v10 = vmul.f32 %v3035_v58, %v3031_v59  ;;  %v1397_v58 = vld [vmem:[#allocation4 + $0x1a8] sm:$0xff] }
0x131c   :  { %2916 = vmatmul.mubr.msk.f32.vlgmr.msra.gmra.mxu0 %vm507_vm14, %v1997_v10  ;;  %v1395_v10 = vld [vmem:[#allocation4 + $0x198] sm:$0xff] }
0x131d   :  { %v3037_v11 = vpop.eup %3036  ;;  %2924 = vmatpush3.msra.mxu0 %v1386_v52  ;;  %v1391_v52 = vld [vmem:[#allocation4 + $0x178] sm:$0xff] }
0x131e   :  { %v1998_v12 = vmul.f32 %v3037_v11, %v3033_v63  ;;  %2925 = vmatprep.subr.mxu0 %v1385_v13  ;;  %v1393_v11 = vld [vmem:[#allocation4 + $0x188] sm:$0xff] }
0x131f   :  { %2926 = vmatpush3.msra.mxu0 %v1385_v13  ;;  %v2289_v13 = vrot.slane %v3335_v50, %v3298_v38 }
0x1320   :  { %2921 = vmatmul.mubr.msk.f32.vlgmr.msra.gmra.mxu1 %vm507_vm14, %v1998_v12  ;;  %2927 = vmatprep.subr.mxu0 %v1384_v54  ;;  %v1392_v12 = vld [vmem:[#allocation4 + $0x180] sm:$0xff] }
0x1321   :  { %2928 = vmatpush3.msra.mxu0 %v1384_v54  ;;  %2935 = vmatpush3.msra.mxu1 %v1390_v45 }
0x1322   :  { %2929 = vmatprep.subr.mxu0 %v1383_v14 }
0x1323   :  { %2930 = vmatpush3.msra.mxu0 %v1383_v14 }
0x1324   :  { %2945 = vmatprep.subr.mxu0 %v1398_v9 }
0x13dc   :  { %v2071_v17 = vpop.f32.mrf.mxu0 }
0x13dd   :  { %2153 = vrot.lane.b32.xlu1 %v2071_v17, %s3109_s24 }
0x13de   :  { %v2917_v18 = vpop.f32.mrf.mxu0 }
0x13e0   :  { %v2147_v19 = vpop.f32.mrf.mxu1 }
0x13e1   :  { %2155 = vrot.lane.b32.xlu0 %v2147_v19, %s3109_s24 }
0x13e2   :  { %v2922_v21 = vpop.f32.mrf.mxu1 }
0x144f   :  { %v2154_v22 = vpop.permute.xlu1 %2153 }
0x1450   :  { %v2159_v4 = vsel %vm351_vm5, %v3397_v5, %v2154_v22 }
0x1451   :  { %2931 = vmatprep.mubr.msk.f32.mxu0 %vm157_vm3, %v2159_v4 }
0x1453   :  { %v2156_v24 = vpop.permute.xlu0 %2155 }
0x1454   :  { %v2160_v26 = vsel %vm351_vm5, %v3399_v6, %v2156_v24 }
0x1455   :  { %2932 = vmatmul.mubr.msk.f32.vlgmr.msra.gmra.mxu0 %vm157_vm3, %v2160_v26 }
0x1456   :  { %2946 = vmatpush3.msra.mxu0 %v1398_v9 }
0x1457   :  { %2947 = vmatprep.subr.mxu0 %v1397_v58 }
0x1458   :  { %2948 = vmatpush3.msra.mxu0 %v1397_v58 }
0x1459   :  { %2949 = vmatprep.subr.mxu0 %v1396_v20 }
0x145a   :  { %2950 = vmatpush3.msra.mxu0 %v1396_v20  ;;  %v2505_v20 = vrot.slane %v3335_v50, %v1369_v37 }
0x145b   :  { %2951 = vmatprep.subr.mxu0 %v1395_v10 }
0x145c   :  { %2952 = vmatpush3.msra.mxu0 %v1395_v10 }
0x145d   :  { %2953 = vmatprep.subr.mxu0 %v1394_v23 }
0x145e   :  { %2954 = vmatpush3.msra.mxu0 %v1394_v23 }
0x145f   :  { %2955 = vmatprep.subr.mxu0 %v1393_v11 }
0x1460   :  { %2956 = vmatpush3.msra.mxu0 %v1393_v11 }
0x1461   :  { %2957 = vmatprep.subr.mxu0 %v1392_v12 }
0x1462   :  { %2958 = vmatpush3.msra.mxu0 %v1392_v12 }
0x1463   :  { %2959 = vmatprep.subr.mxu0 %v1391_v52 }
0x1464   :  { %2960 = vmatpush3.msra.mxu0 %v1391_v52  ;;  %v2511_v52 = vrot.slane %v3335_v50, %v1375_v41 }
0x1515   :  { %v2933_v28 = vpop.f32.mrf.mxu0 }
0x1516   :  { %v2243_v29 = vadd.f32 %v2933_v28, %v2164_v27 }
0x1517   :  { %v2237_v30 = vpop.f32.mrf.mxu0 }
0x1518   :  { %v2238_v31 = vadd.f32 %v2237_v30, %v2164_v27  ;;  %v2247_v32 = vadd.f32 %v2243_v29, %v3327_v49 }
0x151a   :  { %v2251_v33 = vsel %vm157_vm3, %v2247_v32, 0.0  ;;  %v2246_v34 = vadd.f32 %v2238_v31, %v3325_v48  ;;  %v1389_v48 = vld [vmem:[#allocation4 + $0x168] sm:$0xff] }
0x151b   :  { %2252 = vadd.xlane.f32.xlu0 %v2251_v33  ;;  %2936 = vmatprep.subr.mxu1 %v1389_v48 }
0x151c   :  { %v2248_v35 = vsel %vm157_vm3, %v2246_v34, 0.0  ;;  %2937 = vmatpush3.msra.mxu1 %v1389_v48 }
0x151d   :  { %2249 = vadd.xlane.f32.xlu1 %v2248_v35  ;;  %2938 = vmatprep.subr.mxu1 %v1388_v46 }
0x151e   :  { %2939 = vmatpush3.msra.mxu1 %v1388_v46 }
0x151f   :  { %2940 = vmatprep.subr.mxu1 %v1387_v47 }
0x1520   :  { %2941 = vmatpush3.msra.mxu1 %v1387_v47 }
0x15a4   :  { %v2253_v5 = vpop.xlane.xlu0 %2252 }
0x15a5   :  { %v2255_v36 = vmul.f32 0.03125, %v2253_v5 }
0x15a6   :  { %v2250_v6 = vpop.xlane.xlu1 %2249 }
0x15a7   :  { %v2257_v39 = vsub.f32 %v2247_v32, %v2255_v36  ;;  %v2254_v40 = vmul.f32 0.03125, %v2250_v6 }
0x15a9   :  { %v2256_v3 = vsub.f32 %v2246_v34, %v2254_v40  ;;  %v2259_v42 = vmul.f32 %v2257_v39, %v2257_v39 }
0x15ab   :  { %v2263_v43 = vsel %vm157_vm3, %v2259_v42, 0.0  ;;  %v2258_v44 = vmul.f32 %v2256_v3, %v2256_v3 }
0x15ac   :  { %2264 = vadd.xlane.f32.xlu1 %v2263_v43 }
0x15ad   :  { %v2260_v49 = vsel %vm157_vm3, %v2258_v44, 0.0 }
0x15ae   :  { %2261 = vadd.xlane.f32.xlu0 %v2260_v49 }
0x1635   :  { %v2265_v51 = vpop.xlane.xlu1 %2264 }
0x1636   :  { %v2267_v15 = vmul.f32 0.03125, %v2265_v51 }
0x1637   :  { %v2262_v61 = vpop.xlane.xlu0 %2261 }
0x1638   :  { %v2269_v53 = vadd.f32 1e-12, %v2267_v15  ;;  %v2266_v55 = vmul.f32 0.03125, %v2262_v61 }
0x163a   :  { %3038 = vrsqrt.f32 %v2269_v53  ;;  %v2268_v56 = vadd.f32 1e-12, %v2266_v55 }
0x163c   :  { %3040 = vrsqrt.f32 %v2268_v56 }
0x1647   :  { %v3039_v2 = vpop.eup %3038 }
0x1648   :  { %v2273_v25 = vmul.f32 %v3039_v2, %v2257_v39  ;;  %v2392_v39 = vrot.slane %v3335_v50, %v1256_v7 }
0x1649   :  { %v3041_v59 = vpop.eup %3040 }
0x164a   :  { %v2272_v62 = vmul.f32 %v3041_v59, %v2256_v3  ;;  %v2279_v63 = vmul.f32 %v2277_v57, %v2273_v25  ;;  %v2516_v25 = vld [vmem:[#allocation4 + $0x60] sm:$0xff]  ;;  %v2515_v59 = vld [vmem:[#allocation4 + $0x58] sm:$0xff] }
0x164c   :  { %v2278_v16 = vmul.f32 %v2277_v57, %v2272_v62  ;;  %v2285_v60 = vadd.f32 %v2283_v0, %v2279_v63  ;;  %v2517_v57 = vld [vmem:[#allocation4 + $0x68] sm:$0xff]  ;;  %v2514_v62 = vld [vmem:[#allocation4 + $0x50] sm:$0xff] }
0x164d   :  { %2964 = vmatprep.subr.mxu1 %v2517_v57 }
0x164e   :  { %v2284_v8 = vadd.f32 %v2283_v0, %v2278_v16 }
0x1650   :  { %2942 = vmatprep.mubr.msk.f32.mxu1 %vm157_vm3, %v2284_v8 }
0x1651   :  { %2943 = vmatmul.mubr.msk.f32.vlgmr.msra.gmra.mxu1 %vm157_vm3, %v2285_v60 }
0x1652   :  { %2965 = vmatpush3.msra.mxu1 %v2517_v57 }
0x1653   :  { %2966 = vmatprep.subr.mxu1 %v2516_v25 }
0x1654   :  { %2967 = vmatpush3.msra.mxu1 %v2516_v25 }
0x1655   :  { %2968 = vmatprep.subr.mxu1 %v2515_v59 }
0x1656   :  { %2969 = vmatpush3.msra.mxu1 %v2515_v59 }
0x1657   :  { %2970 = vmatprep.subr.mxu1 %v2514_v62 }
0x1658   :  { %2971 = vmatpush3.msra.mxu1 %v2514_v62 }
0x1711   :  { %v2944_v54 = vpop.f32.mrf.mxu1 }
0x1712   :  { %v2368_v14 = vadd.f32 %v2944_v54, %v2289_v13 }
0x1713   :  { %v2362_v17 = vpop.f32.mrf.mxu1 }
0x1714   :  { %v2372_v18 = vmul.f32 %v2368_v14, %v2368_v14  ;;  %v2363_v19 = vadd.f32 %v2362_v17, %v2289_v13  ;;  %v3050_v17 = vld [vmem:[#allocation4] sm:$0xff] }
0x1716   :  { %v2374_v21 = vmul.f32 %v2372_v18, %v2368_v14  ;;  %v2371_v22 = vmul.f32 %v2363_v19, %v2363_v19  ;;  %v2521_v18 = vrot.slane %v3050_v17, %v3298_v38 }
0x1718   :  { %v2376_v4 = vmul.f32 0.044715, %v2374_v21  ;;  %v2373_v24 = vmul.f32 %v2371_v22, %v2363_v19 }
0x171a   :  { %v2378_v26 = vadd.f32 %v2376_v4, %v2368_v14  ;;  %v2375_v27 = vmul.f32 0.044715, %v2373_v24 }
0x171c   :  { %v2380_v28 = vmul.f32 0.7978846, %v2378_v26  ;;  %v2377_v29 = vadd.f32 %v2375_v27, %v2363_v19 }
0x171e   :  { %3042 = vtanh.f32 %v2380_v28  ;;  %v2379_v30 = vmul.f32 0.7978846, %v2377_v29 }
0x1720   :  { %3044 = vtanh.f32 %v2379_v30 }
0x172b   :  { %v3043_v31 = vpop.eup %3042 }
0x172c   :  { %v2384_v32 = vadd.f32 1.0, %v3043_v31 }
0x172d   :  { %v3045_v33 = vpop.eup %3044 }
0x172e   :  { %v2383_v34 = vadd.f32 1.0, %v3045_v33  ;;  %v2386_v35 = vmul.f32 0.5, %v2384_v32 }
0x1730   :  { %v2385_v5 = vmul.f32 0.5, %v2383_v34  ;;  %v2388_v6 = vmul.f32 %v2386_v35, %v2368_v14 }
0x1732   :  { %v2387_v36 = vmul.f32 %v2385_v5, %v2363_v19 }
0x1734   :  { %2961 = vmatprep.mubr.msk.f32.mxu0 %vm71_vm0, %v2387_v36 }
0x1735   :  { %2962 = vmatmul.mubr.msk.f32.vlgmr.msra.gmra.mxu0 %vm71_vm0, %v2388_v6 }
0x17f5   :  { %v2963_v40 = vpop.f32.mrf.mxu0 }
0x17f6   :  { %v2471_v3 = vadd.f32 %v2963_v40, %v2392_v39 }
0x17f7   :  { %v2465_v42 = vpop.f32.mrf.mxu0 }
0x17f8   :  { %v2466_v43 = vadd.f32 %v2465_v42, %v2392_v39  ;;  %v2475_v44 = vadd.f32 %v2471_v3, %v2285_v60 }
0x17fa   :  { %v2479_v49 = vsel %vm157_vm3, %v2475_v44, 0.0  ;;  %v2474_v45 = vadd.f32 %v2466_v43, %v2284_v8 }
0x17fb   :  { %2480 = vadd.xlane.f32.xlu1 %v2479_v49 }
0x17fc   :  { %v2476_v48 = vsel %vm157_vm3, %v2474_v45, 0.0 }
0x17fd   :  { %2477 = vadd.xlane.f32.xlu0 %v2476_v48 }
0x1884   :  { %v2481_v46 = vpop.xlane.xlu1 %2480 }
0x1885   :  { %v2483_v47 = vmul.f32 0.03125, %v2481_v46 }
0x1886   :  { %v2478_v51 = vpop.xlane.xlu0 %2477 }
0x1887   :  { %v2485_v15 = vsub.f32 %v2475_v44, %v2483_v47  ;;  %v2482_v61 = vmul.f32 0.03125, %v2478_v51 }
0x1889   :  { %v2484_v53 = vsub.f32 %v2474_v45, %v2482_v61  ;;  %v2487_v55 = vmul.f32 %v2485_v15, %v2485_v15 }
0x188b   :  { %v2491_v7 = vsel %vm157_vm3, %v2487_v55, 0.0  ;;  %v2486_v56 = vmul.f32 %v2484_v53, %v2484_v53 }
0x188c   :  { %2492 = vadd.xlane.f32.xlu1 %v2491_v7 }
0x188d   :  { %v2488_v2 = vsel %vm157_vm3, %v2486_v56, 0.0 }
0x188e   :  { %2489 = vadd.xlane.f32.xlu0 %v2488_v2 }
0x1915   :  { %v2493_v63 = vpop.xlane.xlu1 %2492 }
0x1916   :  { %v2495_v0 = vmul.f32 0.03125, %v2493_v63 }
0x1917   :  { %v2490_v16 = vpop.xlane.xlu0 %2489 }
0x1918   :  { %v2497_v8 = vadd.f32 1e-12, %v2495_v0  ;;  %v2494_v60 = vmul.f32 0.03125, %v2490_v16 }
0x191a   :  { %3046 = vrsqrt.f32 %v2497_v8  ;;  %v2496_v9 = vadd.f32 1e-12, %v2494_v60 }
0x191c   :  { %3048 = vrsqrt.f32 %v2496_v9 }
0x1927   :  { %v3047_v58 = vpop.eup %3046 }
0x1928   :  { %v2501_v10 = vmul.f32 %v3047_v58, %v2485_v15 }
0x1929   :  { %v3049_v23 = vpop.eup %3048 }
0x192a   :  { %v2500_v11 = vmul.f32 %v3049_v23, %v2484_v53  ;;  %v2507_v12 = vmul.f32 %v2505_v20, %v2501_v10 }
0x192c   :  { %v2506_v13 = vmul.f32 %v2505_v20, %v2500_v11  ;;  %v2513_v14 = vadd.f32 %v2511_v52, %v2507_v12 }
0x192e   :  { %v2512_v54 = vadd.f32 %v2511_v52, %v2506_v13 }
0x1930   :  { %2972 = vmatprep.mubr.msk.f32.mxu1 %vm157_vm3, %v2512_v54 }
0x1931   :  { %2973 = vmatmul.mubr.msk.f32.vlgmr.msra.gmra.mxu1 %vm157_vm3, %v2513_v14 }
0x19f1   :  { %v2974_v19 = vpop.f32.mrf.mxu1 }
0x19f2   :  { %v2600_v37 = vadd.f32 %v2974_v19, %v2521_v18 }
0x19f3   :  { %v2594_v21 = vpop.f32.mrf.mxu1 }
0x19f4   :  { %2604 = vst [vmem:[%s3467_s2 + $0x8] sm:$0xff] %v2600_v37  ;;  %v2595_v1 = vadd.f32 %v2594_v21, %v2521_v18 }
0x19f6   :  { %2603 = vst [vmem:[%s3467_s2] sm:$0xff] %v2595_v1 }
0x19f7   :  { %2609 = vsyncpa [#allocation3], 1 }
0x19f8   :  { %2610 = vsyncpa [#allocation5], 1 }

</bundles_post_ra>
